<compile_context>
chip_gen: v6e
topology: v6e:2x2x1
jax: 0.10.0
libtpu: 0.0.40
codegen_flags: <defaults>
</compile_context>

<pallas_src>
import functools

import jax
import jax.numpy as jnp
from jax.experimental import pallas as pl
from jax.experimental.pallas import tpu as pltpu


def _logbinomial_kernel(x_ref, lbc_ref, kidx_ref, o_ref, *, km1_over_t, eps):
    """One (1, K, thw) output tile.

    x_ref    : (1, 1, thw) f32  per-pixel probabilities (lane-dense)
    lbc_ref  : (K, 1)      f32  log C(K-1, k) / t        (grid-resident)
    kidx_ref : (K, 1)      f32  k / t                    (grid-resident)
    o_ref    : (1, K, thw)      softmax_k distribution   (NCHW-contiguous)
    """
    x = x_ref[0]                                     # (1, thw)
    one_minus_x = jnp.clip(1.0 - x, eps, 1.0)        # clip(1-x) before clip(x), as in ref
    xc = jnp.clip(x, eps, 1.0)
    log_x = jnp.log(xc)                              # (1, thw)
    log_1mx = jnp.log(one_minus_x)                   # (1, thw)

    d = log_x - log_1mx                              # (1, thw)  per-pixel
    c = log_1mx * km1_over_t                         # (1, thw)  per-pixel, 1/t pre-folded

    # y/t = lbc/t + (k/t)*d + ((K-1)/t)*log_1mx ; big-array work: 1 mul + 2 adds.
    y = lbc_ref[...] + kidx_ref[...] * d + c         # (K, thw)

    # softmax over the class (sublane) axis.
    m = jnp.max(y, axis=0, keepdims=True)            # (1, thw)
    unnorm = jnp.exp(y - m)                          # (K, thw)  (EUP)
    denom = jnp.sum(unnorm, axis=0, keepdims=True)   # (1, thw)
    inv = 1.0 / denom                                # exact per-pixel reciprocal (no approx)
    o_ref[0] = (unnorm * inv).astype(o_ref.dtype)


def _largest_div128(total, cap):
    """Largest multiple of 128 that divides `total` (a multiple of 128) and is <= cap."""
    cap = min(int(cap), int(total))
    t = max(128, (cap // 128) * 128)
    while t > 128 and total % t != 0:
        t -= 128
    return t


def log_binomial_forward(x, n_classes=256, t=1.0, eps=1e-4, max_tile=2048,
                         out_dtype=jnp.float32):
    """JAX/Pallas equivalent of LogBinomial(n_classes).forward(x, t, eps).

    x: (N, 1, H, W) or (N, H, W) float32 probabilities.
    returns: (N, n_classes, H, W) softmax distribution (NCHW, no post-kernel
             transpose).  out_dtype=jnp.bfloat16 halves HBM store bytes if the
             downstream bin-center reduction tolerates it.
    """
    x = jnp.asarray(x, jnp.float32)
    if x.ndim == 3:
        x = x[:, None]
    N, C, H, W = x.shape
    assert C == 1, "LogBinomial broadcast requires a single input channel"
    K = n_classes

    HW = H * W
    HWp = ((HW + 127) // 128) * 128              # lane-pad the spatial axis

    # Lane tile: largest multiple-of-128 divisor of HWp (no ragged tail blocks).
    thw = _largest_div128(HWp, max_tile)
    # v7x megacore: make sure the parallel grid has >= 2 steps when the data allows.
    if N * (HWp // thw) < 2 and HWp >= 256:
        thw = _largest_div128(HWp, HWp // 2)

    xf = x.reshape(N, 1, HW)
    if HWp != HW:
        # TODO(synk): handle the ragged tail with an in-kernel masked last block
        # to avoid the post-kernel slice copy (typical ZoeDepth shapes never pad).
        xf = jnp.pad(xf, ((0, 0), (0, 0), (0, HWp - HW)), constant_values=0.5)

    # Per-class constants, computed once in the wrapper with the same f32 jnp
    # expressions as the reference; 1/t is folded in here (exact when t == 1).
    inv_t = jnp.float32(1.0 / float(t))
    k_col = jnp.arange(K, dtype=jnp.float32).reshape(K, 1)
    e7 = 1e-7
    n_f = jnp.float32(K - 1) + e7
    kk = k_col + e7
    log_binom_c = (n_f * jnp.log(n_f)
                   - kk * jnp.log(kk)
                   - (n_f - kk) * jnp.log(n_f - kk + e7))        # (K, 1)
    lbc_t = log_binom_c * inv_t                                   # (K, 1)  lbc / t
    k_t = k_col * inv_t                                           # (K, 1)  k / t
    km1_over_t = float(K - 1) / float(t)                          # static scalar

    kernel = functools.partial(_logbinomial_kernel,
                               km1_over_t=km1_over_t, eps=float(eps))

    out = pl.pallas_call(
        kernel,
        out_shape=jax.ShapeDtypeStruct((N, K, HWp), out_dtype),
        grid_spec=pltpu.PrefetchScalarGridSpec(
            num_scalar_prefetch=0,
            grid=(N, HWp // thw),
            in_specs=[
                pl.BlockSpec((1, 1, thw), lambda n, j: (n, 0, j)),   # x (lane-dense)
                pl.BlockSpec((K, 1), lambda n, j: (0, 0)),           # lbc/t (resident)
                pl.BlockSpec((K, 1), lambda n, j: (0, 0)),           # k/t   (resident)
            ],
            out_specs=pl.BlockSpec((1, K, thw), lambda n, j: (n, 0, j)),
        ),
        compiler_params=pltpu.CompilerParams(
            dimension_semantics=("parallel", "parallel"),
            vmem_limit_bytes=48 * 1024 * 1024),
    )(xf, lbc_t, k_t)

    if HWp != HW:
        out = out[:, :, :HW]
    return out.reshape(N, K, H, W)     # NCHW, no transpose needed


def _reference(x, n_classes=256, t=1.0, eps=1e-4):
    """Pure-JAX reference (mirrors the PyTorch module) for a sanity check."""
    if x.ndim == 3:
        x = x[:, None]
    K = n_classes
    k_idx = jnp.arange(K, dtype=jnp.float32).reshape(1, K, 1, 1)
    K_minus_1 = jnp.full((1, 1, 1, 1), K - 1, dtype=jnp.float32)

    def log_binom(n, k, e=1e-7):
        n = n + e
        k = k + e
        return n * jnp.log(n) - k * jnp.log(k) - (n - k) * jnp.log(n - k + e)

    one_minus_x = jnp.clip(1.0 - x, eps, 1.0)
    xc = jnp.clip(x, eps, 1.0)
    y = (log_binom(K_minus_1, k_idx)
         + k_idx * jnp.log(xc)
         + (K - 1 - k_idx) * jnp.log(one_minus_x))
    return jax.nn.softmax(y / t, axis=1)


if __name__ == "__main__":
    key = jax.random.PRNGKey(0)
    N, C, H, W = 2, 1, 16, 16
    n_classes = 256
    # Input probabilities in (0, 1), as the module expects.
    x = jax.random.uniform(key, (N, C, H, W), dtype=jnp.float32,
                           minval=0.01, maxval=0.99)

    out = log_binomial_forward(x, n_classes=n_classes, t=1.0, eps=1e-4)
    out = jax.block_until_ready(out)

    ref = _reference(x, n_classes=n_classes, t=1.0, eps=1e-4)
    assert out.shape == (N, n_classes, H, W)
    assert bool(jnp.all(jnp.isfinite(out)))
    # Exact (non-approx) reciprocal keeps the distribution normalized to ~1e-6.
    assert bool(jnp.allclose(jnp.sum(out, axis=1), 1.0, atol=1e-5))
    # Logits span O(1e3); the algebraic refactor (k*(log_x-log_1mx) + (K-1)*log_1mx)
    # adds ~1e-4-level f32 cancellation error in y, which maps to ~1e-4-level
    # relative differences in the softmax output, hence this tolerance.
    assert bool(jnp.allclose(out, ref, atol=2e-4, rtol=2e-3))

    print("KERNEL_OK")
</pallas_src>

<mosaic_0001>
module attributes {stable_mosaic.version = 11 : i64} {
  func.func @_logbinomial_kernel(%arg0: i32, %arg1: i32, %arg2: memref<1x1x256xf32, #tpu.memory_space<vmem>>, %arg3: memref<256x1xf32, #tpu.memory_space<vmem>>, %arg4: memref<256x1xf32, #tpu.memory_space<vmem>>, %arg5: memref<1x256x256xf32, #tpu.memory_space<vmem>>) attributes {dimension_semantics = [#tpu.dimension_semantics<parallel>, #tpu.dimension_semantics<parallel>], iteration_bounds = array<i64: 2, 1>, scalar_prefetch = 0 : i64, scratch_operands = 0 : i64, tpu.core_type = #tpu.core_type<tc>, window_params = [{transform_indices = @transform_0, window_bounds = array<i64: 1, 1, 256>}, {pipeline_mode = #tpu.pipeline_mode<synchronous>, transform_indices = @transform_1, window_bounds = array<i64: 256, 1>}, {pipeline_mode = #tpu.pipeline_mode<synchronous>, transform_indices = @transform_2, window_bounds = array<i64: 256, 1>}, {transform_indices = @transform_3, window_bounds = array<i64: 1, 256, 256>}]} {
    %c0 = arith.constant 0 : index
    %c0_0 = arith.constant 0 : index
    %c0_1 = arith.constant 0 : index
    %0 = vector.load %arg2[%c0, %c0_0, %c0_1] : memref<1x1x256xf32, #tpu.memory_space<vmem>>, vector<1x1x256xf32>
    %1 = vector.shape_cast %0 : vector<1x1x256xf32> to vector<1x256xf32>
    %cst = arith.constant 1.000000e+00 : f32
    %2 = vector.broadcast %cst : f32 to vector<1x256xf32>
    %3 = arith.subf %2, %1 : vector<1x256xf32>
    %cst_2 = arith.constant 9.99999974E-5 : f32
    %cst_3 = arith.constant 1.000000e+00 : f32
    %4 = vector.broadcast %cst_2 : f32 to vector<1x256xf32>
    %5 = arith.maximumf %4, %3 : vector<1x256xf32>
    %6 = vector.broadcast %cst_3 : f32 to vector<1x256xf32>
    %7 = arith.minimumf %6, %5 : vector<1x256xf32>
    %cst_4 = arith.constant 9.99999974E-5 : f32
    %cst_5 = arith.constant 1.000000e+00 : f32
    %8 = vector.broadcast %cst_4 : f32 to vector<1x256xf32>
    %9 = arith.maximumf %8, %1 : vector<1x256xf32>
    %10 = vector.broadcast %cst_5 : f32 to vector<1x256xf32>
    %11 = arith.minimumf %10, %9 : vector<1x256xf32>
    %12 = math.log %11 : vector<1x256xf32>
    %13 = math.log %7 : vector<1x256xf32>
    %14 = arith.subf %12, %13 : vector<1x256xf32>
    %cst_6 = arith.constant 2.550000e+02 : f32
    %15 = vector.broadcast %cst_6 : f32 to vector<1x256xf32>
    %16 = arith.mulf %13, %15 : vector<1x256xf32>
    %c0_7 = arith.constant 0 : index
    %c0_8 = arith.constant 0 : index
    %17 = vector.load %arg3[%c0_7, %c0_8] : memref<256x1xf32, #tpu.memory_space<vmem>>, vector<256x1xf32>
    %c0_9 = arith.constant 0 : index
    %c0_10 = arith.constant 0 : index
    %18 = vector.load %arg4[%c0_9, %c0_10] : memref<256x1xf32, #tpu.memory_space<vmem>>, vector<256x1xf32>
    %19 = vector.broadcast %18 : vector<256x1xf32> to vector<256x256xf32>
    %20 = vector.broadcast %14 : vector<1x256xf32> to vector<256x256xf32>
    %21 = arith.mulf %19, %20 : vector<256x256xf32>
    %22 = vector.broadcast %17 : vector<256x1xf32> to vector<256x256xf32>
    %23 = arith.addf %22, %21 : vector<256x256xf32>
    %24 = vector.broadcast %16 : vector<1x256xf32> to vector<256x256xf32>
    %25 = arith.addf %23, %24 : vector<256x256xf32>
    %cst_11 = arith.constant dense<0xFF800000> : vector<256xf32>
    %26 = vector.multi_reduction <maximumf>, %25, %cst_11 [0] : vector<256x256xf32> to vector<256xf32>
    %27 = vector.shape_cast %26 : vector<256xf32> to vector<1x256xf32>
    %28 = vector.broadcast %27 : vector<1x256xf32> to vector<256x256xf32>
    %29 = arith.subf %25, %28 : vector<256x256xf32>
    %30 = math.exp %29 : vector<256x256xf32>
    %cst_12 = arith.constant dense<0.000000e+00> : vector<256xf32>
    %31 = vector.multi_reduction <add>, %30, %cst_12 [0] : vector<256x256xf32> to vector<256xf32>
    %32 = vector.shape_cast %31 : vector<256xf32> to vector<1x256xf32>
    %cst_13 = arith.constant 1.000000e+00 : f32
    %33 = vector.broadcast %cst_13 : f32 to vector<1x256xf32>
    %34 = arith.divf %33, %32 : vector<1x256xf32>
    %35 = vector.broadcast %34 : vector<1x256xf32> to vector<256x256xf32>
    %36 = arith.mulf %30, %35 : vector<256x256xf32>
    %c0_14 = arith.constant 0 : index
    %c0_15 = arith.constant 0 : index
    %c0_16 = arith.constant 0 : index
    %37 = vector.load %arg5[%c0_14, %c0_15, %c0_16] : memref<1x256x256xf32, #tpu.memory_space<vmem>>, vector<1x256x256xf32>
    %38 = vector.shape_cast %37 : vector<1x256x256xf32> to vector<256x256xf32>
    %39 = vector.shape_cast %36 : vector<256x256xf32> to vector<1x256x256xf32>
    tpu.vector_store %arg5[%c0_14, %c0_15, %c0_16], %39 {strides = array<i32>} : memref<1x256x256xf32, #tpu.memory_space<vmem>>, vector<1x256x256xf32>,
    return
  }
  func.func @transform_0(%arg0: i32, %arg1: i32) -> (i32, i32, i32) {
    %c0_i32 = arith.constant 0 : i32
    %c0_i32_0 = arith.constant 0 : i32
    return %arg0, %c0_i32, %arg1 : i32, i32, i32
  }
  func.func @transform_1(%arg0: i32, %arg1: i32) -> (i32, i32) {
    %c0_i32 = arith.constant 0 : i32
    %c0_i32_0 = arith.constant 0 : i32
    %c0_i32_1 = arith.constant 0 : i32
    return %c0_i32, %c0_i32_0 : i32, i32
  }
  func.func @transform_2(%arg0: i32, %arg1: i32) -> (i32, i32) {
    %c0_i32 = arith.constant 0 : i32
    %c0_i32_0 = arith.constant 0 : i32
    %c0_i32_1 = arith.constant 0 : i32
    return %c0_i32, %c0_i32_0 : i32, i32
  }
  func.func @transform_3(%arg0: i32, %arg1: i32) -> (i32, i32, i32) {
    %c0_i32 = arith.constant 0 : i32
    %c0_i32_0 = arith.constant 0 : i32
    return %arg0, %c0_i32, %arg1 : i32, i32, i32
  }
}

</mosaic_0001>

<bundles_post_ra>
// kernel: tpu_custom_call.1
= control target key start
LH: loop header
LB: loop body
LE: loop exit
PB: predicated region body
PF: predicated region fallthrough
CT: control target
= control target key end

     0   :  { %8 = vsyncpa [#allocation3], 0  ;;  %s2985_s0 = inlined_call_operand.vmem [shape: f32[2,1,256], index: 0, kind: input, shape index: {}]   ;;  %s2986_s1 = inlined_call_operand.vmem [shape: f32[256,1], index: 1, kind: input, shape index: {}]   ;;  %s2987_s2 = inlined_call_operand.vmem [shape: f32[256,1], index: 2, kind: input, shape index: {}]   ;;  %s2988_s3 = inlined_call_operand.hbm [shape: f32[2,256,256], index: 3, kind: output, shape index: {}]  }
   0x1   :  { %10 = vsyncpa [#allocation3 + $0x1], 0  ;;  %s1682_s12 = smov 0   ;;  %s1684_s13 = smov 0  }
   0x2   :  { %s1686_s14 = smov 0   ;;  %s1688_s15 = smov 0  }
   0x3   :  { %s1690_s16 = smov 0   ;;  %s1692_s17 = smov 0  }
   0x4 LB: > { %s1371_s18 = sadd.s32 4294967295, %s1656_s17   ;;  %s1372_s19 = sadd.s32 4294967294, %s1656_s17   ;;  %s1656_s17 = sphi %s1692_s17, %s16_s17   ;;  %s1652_s16 = sphi %s1690_s16, %s3172_s16   ;;  %s1648_s15 = sphi %s1688_s15, %s3171_s15   ;;  %s1644_s14 = sphi %s1686_s14, %s3170_s14   ;;  %s1640_s13 = sphi %s1684_s13, %s3169_s13   ;;  %s1636_s12 = sphi %s1682_s12, %s3168_s12  }
   0x5   : > { %s28_s20 = sadd.s32 1, %s1652_s16  ;;  %s107_s21 = sadd.s32 1, %s1644_s14 }
   0x6   : > { %p30_p0 = scmp.ge.s32.totalorder %s28_s20, 2  ;;  %p117_p1 = scmp.ne.s32.totalorder %s1644_s14, %s1640_s13 }
   0x7   : > { %p118_p2 = scmp.eq.s32.totalorder %s1371_s18, 1  ;;  %p123_p3 = scmp.ne.s32.totalorder %s1640_s13, %s1636_s12 }
   0x8   : > { %s3174_s20 = smov (%p30_p0, %s28_s20), 0  ;;  %p124_p5 = scmp.eq.s32.totalorder %s1372_s19, 1 }
   0x9   : > { %p1722_p4 = por %p118_p2, %p117_p1  ;;  %s102_s23 = ssub.s32 %s1652_s16, %s3174_s20 }
   0xa   : > { %p1375_p6 = scmp.ge.s32.totalorder %s1656_s17, 1  ;;  %p105_p7 = scmp.eq.s32.totalorder %s102_s23, 0 }
   0xb   : > { %p1729_p8 = por %p124_p5, %p123_p3  ;;  %p160_p9 = scmp.lt.s32.totalorder %s1656_s17, 3 }
   0xc   : > { %s1735_s25 = scalar_select %p105_p7, %s1644_s14, %s107_s21  }
   0xd   : > { %p161_p10 = pnand %p1375_p6, %p160_p9 }
   0xf   : > { %164 = sbr.rel (%p161_p10) target bundleno = 448 (0x1c0), region = 32 }
  0x14   : > { %v243_v0 = vld [vmem:[%s2987_s2 + $0x10] sm:$0xff]  ;;  %v241_v1 = vld [vmem:[%s2987_s2] sm:$0xff]  ;;  %v1658_v2 = vmov 0   ;;  %v244_v3 = vld [vmem:[%s2987_s2 + $0x18] sm:$0xff]  ;;  %p188_p11 = scmp.lt.s32.totalorder %s1648_s15, 1  ;;  %s184_s19 = sand.u32 1, %s1640_s13  }
  0x15   : > { %1443 = vset.pattern.permute.xlu1 %v1658_v2  ;;  %1442 = vset.pattern.permute.xlu0 %v1658_v2  ;;  %v242_v4 = vld [vmem:[%s2987_s2 + $0x8] sm:$0xff]  ;;  %v245_v6 = vld [vmem:[%s2987_s2 + $0x20] sm:$0xff]  ;;  %v248_v7 = vld [vmem:[%s2987_s2 + $0x38] sm:$0xff]  ;;  %s1383_s26 = sshll.u32 %s1648_s15, 13  ;;  %s2940_s30 = scalar_lea.sflag [#allocation3], %s184_s19 }
  0x16   : > { %285 = vperm.xlu1 %1443, %v243_v0   ;;  %275 = vperm.xlu0 %1442, %v241_v1   ;;  %v246_v5 = vld [vmem:[%s2987_s2 + $0x28] sm:$0xff]  ;;  %v247_v8 = vld [vmem:[%s2987_s2 + $0x30] sm:$0xff]  ;;  %v249_v9 = vld [vmem:[%s2987_s2 + $0x40] sm:$0xff]  ;;  %s189_s6 = scalar_select %p188_p11, %s1648_s15, 1 }
  0x17   : > { %v209_v10 = vld [vmem:[%s2986_s1] sm:$0xff]  ;;  %v210_v11 = vld [vmem:[%s2986_s1 + $0x8] sm:$0xff]  ;;  %v211_v12 = vld [vmem:[%s2986_s1 + $0x10] sm:$0xff]  ;;  %s2914_s29 = scalar_lea.hbm %s2988_s3, %s1383_s26  ;;  %s1659_s5 = smov [#allocation2]  }
  0x18   : > { %v212_v13 = vld [vmem:[%s2986_s1 + $0x18] sm:$0xff]  ;;  %v213_v14 = vld [vmem:[%s2986_s1 + $0x20] sm:$0xff]  ;;  %v214_v15 = vld [vmem:[%s2986_s1 + $0x28] sm:$0xff]  ;;  %s1377_s11 = sshll.u32 %s189_s6, 1  ;;  %s1584_s6 = sshll.u32 %s1659_s5, 4  ;;  %s1585_s6 = int_to_ptr.vmem [resolvable:$false] %s1584_s6 }
  0x19   : > { %v250_v16 = vld [vmem:[%s2987_s2 + $0x48] sm:$0xff]  ;;  %v215_v17 = vld [vmem:[%s2986_s1 + $0x30] sm:$0xff]  ;;  %v216_v18 = vld [vmem:[%s2986_s1 + $0x38] sm:$0xff]  ;;  %s194_s21 = scalar_lea.vmem %s2985_s0, %s1377_s11  ;;  %s1586_s7 = scalar_lea.vmem %s1585_s6, 16384 }
  0x1a   : > { %290 = vperm.xlu1 %1443, %v244_v3   ;;  %280 = vperm.xlu0 %1442, %v242_v4   ;;  %v251_v19 = vld [vmem:[%s2987_s2 + $0x50] sm:$0xff]  ;;  %v252_v20 = vld [vmem:[%s2987_s2 + $0x58] sm:$0xff]  ;;  %v217_v21 = vld [vmem:[%s2986_s1 + $0x40] sm:$0xff] }
  0x1b   : > { %v218_v22 = vld [vmem:[%s2986_s1 + $0x48] sm:$0xff]  ;;  %v253_v23 = vld [vmem:[%s2987_s2 + $0x60] sm:$0xff]  ;;  %v219_v25 = vld [vmem:[%s2986_s1 + $0x50] sm:$0xff] }
  0x1c   : > { %v254_v24 = vld [vmem:[%s2987_s2 + $0x68] sm:$0xff]  ;;  %v220_v26 = vld [vmem:[%s2986_s1 + $0x58] sm:$0xff]  ;;  %v255_v27 = vld [vmem:[%s2987_s2 + $0x70] sm:$0xff] }
  0x1d   : > { %v256_v28 = vld [vmem:[%s2987_s2 + $0x78] sm:$0xff]  ;;  %v221_v29 = vld [vmem:[%s2986_s1 + $0x60] sm:$0xff]  ;;  %v222_v30 = vld [vmem:[%s2986_s1 + $0x68] sm:$0xff] }
  0x1e   : > { %300 = vperm.xlu1 %1443, %v246_v5   ;;  %295 = vperm.xlu0 %1442, %v245_v6   ;;  %v257_v31 = vld [vmem:[%s2987_s2 + $0x80] sm:$0xff]  ;;  %v258_v32 = vld [vmem:[%s2987_s2 + $0x88] sm:$0xff]  ;;  %v223_v33 = vld [vmem:[%s2986_s1 + $0x70] sm:$0xff] }
  0x1f   : > { %v224_v34 = vld [vmem:[%s2986_s1 + $0x78] sm:$0xff]  ;;  %v259_v35 = vld [vmem:[%s2987_s2 + $0x90] sm:$0xff]  ;;  %v225_v37 = vld [vmem:[%s2986_s1 + $0x80] sm:$0xff] }
  0x20   : > { %v260_v36 = vld [vmem:[%s2987_s2 + $0x98] sm:$0xff]  ;;  %v226_v38 = vld [vmem:[%s2986_s1 + $0x88] sm:$0xff]  ;;  %v261_v39 = vld [vmem:[%s2987_s2 + $0xa0] sm:$0xff] }
  0x21   : > { %v262_v40 = vld [vmem:[%s2987_s2 + $0xa8] sm:$0xff]  ;;  %v227_v41 = vld [vmem:[%s2986_s1 + $0x90] sm:$0xff]  ;;  %v228_v42 = vld [vmem:[%s2986_s1 + $0x98] sm:$0xff] }
  0x22   : > { %310 = vperm.xlu1 %1443, %v248_v7   ;;  %305 = vperm.xlu0 %1442, %v247_v8   ;;  %v263_v43 = vld [vmem:[%s2987_s2 + $0xb0] sm:$0xff]  ;;  %v264_v44 = vld [vmem:[%s2987_s2 + $0xb8] sm:$0xff]  ;;  %v229_v45 = vld [vmem:[%s2986_s1 + $0xa0] sm:$0xff]  ;;  %v434_v7 = vlaneseq }
  0x23   : > { %v230_v46 = vld [vmem:[%s2986_s1 + $0xa8] sm:$0xff]  ;;  %v265_v47 = vld [vmem:[%s2987_s2 + $0xc0] sm:$0xff]  ;;  %v231_v49 = vld [vmem:[%s2986_s1 + $0xb0] sm:$0xff] }
  0x24   : > { %v266_v48 = vld [vmem:[%s2987_s2 + $0xc8] sm:$0xff]  ;;  %v232_v50 = vld [vmem:[%s2986_s1 + $0xb8] sm:$0xff]  ;;  %v197_v51 = vld [vmem:[%s194_s21] sm:$0x3]  ;;  %s1376_s21 = sshll.u32 %s184_s19, 9 }
  0x25   : > { %v267_v52 = vld [vmem:[%s2987_s2 + $0xd0] sm:$0xff]  ;;  %v268_v53 = vld [vmem:[%s2987_s2 + $0xd8] sm:$0xff]  ;;  %v198_v54 = vsub.f32 1.0, %v197_v51  ;;  %v233_v55 = vld [vmem:[%s2986_s1 + $0xc0] sm:$0xff]  ;;  %v201_v57 = vmax.f32 %v197_v51, 0.0001 }
  0x26   : > { %315 = vperm.xlu0 %1442, %v249_v9   ;;  %510 = vperm.xlu1 %1443, %v209_v10   ;;  %v234_v56 = vld [vmem:[%s2986_s1 + $0xc8] sm:$0xff]  ;;  %v269_v59 = vld [vmem:[%s2987_s2 + $0xe0] sm:$0xff]  ;;  %v235_v63 = vld [vmem:[%s2986_s1 + $0xd0] sm:$0xff]  ;;  %s2751_s23 = scalar_lea.vmem [#allocation2], %s1376_s21 }
  0x27   : > { %v199_v58 = vmax.f32 %v198_v54, 0.0001  ;;  %v270_v60 = vld [vmem:[%s2987_s2 + $0xe8] sm:$0xff]  ;;  %v202_v61 = vmin.f32 %v201_v57, 1.0  ;;  %v236_v0 = vld [vmem:[%s2986_s1 + $0xd8] sm:$0xff]  ;;  %v271_v1 = vld [vmem:[%s2987_s2 + $0xf0] sm:$0xff] }
  0x28   : > { %v272_v2 = vld [vmem:[%s2987_s2 + $0xf8] sm:$0xff]  ;;  %v237_v3 = vld [vmem:[%s2986_s1 + $0xe0] sm:$0xff]  ;;  %v238_v4 = vld [vmem:[%s2986_s1 + $0xe8] sm:$0xff]  ;;  %s1295_s27 = sshll.u32 %s2751_s23, 4  ;;  %s2916_s27 = int_to_ptr.vmem [resolvable:$true] %s1295_s27 }
  0x29   : > { %v200_v62 = vmin.f32 %v199_v58, 1.0  ;;  %1444 = vlog2.f32 %v202_v61  ;;  %v239_v5 = vld [vmem:[%s2986_s1 + $0xf0] sm:$0xff]  ;;  %v240_v8 = vld [vmem:[%s2986_s1 + $0xf8] sm:$0xff]  ;;  %s1580_s4 = scalar_lea.vmem %s2916_s27, 8192  ;;  %p1587_p1 = scmp.lt.s32.totalorder %s2916_s27, %s1585_s6 }
  0x2a   : > { %515 = vperm.xlu0 %1442, %v210_v11   ;;  %520 = vperm.xlu1 %1443, %v211_v12   ;;  %v435_v12 = vshrl.u32 %v434_v7, 7  ;;  %p1581_p12 = scmp.ne.s32.totalorder %s2916_s27, %s1580_s4  ;;  %p1588_p2 = scmp.lt.s32.totalorder %s1586_s7, %s1580_s4 }
  0x2b   : > { %1446 = vlog2.f32 %v200_v62 }
  0x2c   : > { %p1582_p13 = pnand %p1581_p12, %p1722_p4  ;;  %p1589_p3 = por %p1588_p2, %p1587_p1 }
  0x2e   : > { %525 = vperm.xlu0 %1442, %v212_v13   ;;  %530 = vperm.xlu1 %1443, %v213_v14   ;;  %p1583_p0 = pneg %p1582_p13 }
  0x30   : > { %p1590_p5 = pnand %p1589_p3, %p1583_p0 }
  0x32   : > { %535 = vperm.xlu0 %1442, %v214_v15   ;;  %320 = vperm.xlu1 %1443, %v250_v16  }
  0x36   : > { %540 = vperm.xlu0 %1442, %v215_v17   ;;  %545 = vperm.xlu1 %1443, %v216_v18   ;;  %v1445_v6 = vpop.eup %1444  ;;  %v436_v17 = vsub.s32 0, %v435_v12  ;;  %v440_v18 = vsub.s32 1, %v435_v12 }
  0x37   : > { %v204_v13 = vmul.f32 0.6931472, %v1445_v6 }
  0x38   : > { %v1447_v9 = vpop.eup %1446 }
  0x39   : > { %v206_v14 = vmul.f32 0.6931472, %v1447_v9 }
  0x3a   : > { %325 = vperm.xlu0 %1442, %v251_v19   ;;  %330 = vperm.xlu1 %1443, %v252_v20  }
  0x3b   : > { %v207_v19 = vsub.f32 %v204_v13, %v206_v14 }
  0x3e   : > { %550 = vperm.xlu0 %1442, %v217_v21   ;;  %555 = vperm.xlu1 %1443, %v218_v22   ;;  %v1934_v22 = vrot.slane %v207_v19, %v436_v17 }
  0x42   : > { %335 = vperm.xlu0 %1442, %v253_v23   ;;  %340 = vperm.xlu1 %1443, %v254_v24   ;;  %v1936_v23 = vrot.slane %v207_v19, %v440_v18 }
  0x46   : > { %560 = vperm.xlu0 %1442, %v219_v25   ;;  %565 = vperm.xlu1 %1443, %v220_v26   ;;  %v208_v26 = vmul.f32 255.0, %v206_v14 }
  0x4a   : > { %345 = vperm.xlu0 %1442, %v255_v27   ;;  %350 = vperm.xlu1 %1443, %v256_v28  }
  0x4e   : > { %570 = vperm.xlu0 %1442, %v221_v29   ;;  %575 = vperm.xlu1 %1443, %v222_v30  }
  0x52   : > { %355 = vperm.xlu0 %1442, %v257_v31   ;;  %360 = vperm.xlu1 %1443, %v258_v32  }
  0x56   : > { %580 = vperm.xlu0 %1442, %v223_v33   ;;  %585 = vperm.xlu1 %1443, %v224_v34   ;;  %v1942_v33 = vrot.slane %v208_v26, %v436_v17  ;;  %v1944_v34 = vrot.slane %v208_v26, %v440_v18 }
  0x5a   : > { %365 = vperm.xlu0 %1442, %v259_v35   ;;  %370 = vperm.xlu1 %1443, %v260_v36  }
  0x5e   : > { %590 = vperm.xlu0 %1442, %v225_v37   ;;  %595 = vperm.xlu1 %1443, %v226_v38  }
  0x62   : > { %375 = vperm.xlu0 %1442, %v261_v39   ;;  %380 = vperm.xlu1 %1443, %v262_v40  }
  0x66   : > { %600 = vperm.xlu0 %1442, %v227_v41   ;;  %605 = vperm.xlu1 %1443, %v228_v42  }
  0x6a   : > { %385 = vperm.xlu0 %1442, %v263_v43   ;;  %390 = vperm.xlu1 %1443, %v264_v44  }
  0x6e   : > { %610 = vperm.xlu0 %1442, %v229_v45   ;;  %615 = vperm.xlu1 %1443, %v230_v46  }
  0x72   : > { %395 = vperm.xlu0 %1442, %v265_v47   ;;  %400 = vperm.xlu1 %1443, %v266_v48  }
  0x76   : > { %620 = vperm.xlu0 %1442, %v231_v49   ;;  %625 = vperm.xlu1 %1443, %v232_v50  }
  0x7a   : > { %405 = vperm.xlu0 %1442, %v267_v52   ;;  %410 = vperm.xlu1 %1443, %v268_v53  }
  0x7e   : > { %630 = vperm.xlu0 %1442, %v233_v55   ;;  %635 = vperm.xlu1 %1443, %v234_v56  }
  0x82   : > { %415 = vperm.xlu0 %1442, %v269_v59   ;;  %420 = vperm.xlu1 %1443, %v270_v60  }
  0x86   : > { %640 = vperm.xlu0 %1442, %v235_v63   ;;  %645 = vperm.xlu1 %1443, %v236_v0  }
  0x8a   : > { %425 = vperm.xlu0 %1442, %v271_v1   ;;  %430 = vperm.xlu1 %1443, %v272_v2  }
  0x8e   : > { %650 = vperm.xlu0 %1442, %v237_v3   ;;  %655 = vperm.xlu1 %1443, %v238_v4  }
  0x91   : > { %v286_v10 = vpop.permute.xlu1 %285  ;;  %v276_v11 = vpop.permute.xlu0 %275 }
  0x92   : > { %660 = vperm.xlu0 %1442, %v239_v5   ;;  %665 = vperm.xlu1 %1443, %v240_v8   ;;  %v444_v27 = vmul.f32 %v1934_v22, %v276_v11  ;;  %v445_v28 = vmul.f32 %v1936_v23, %v276_v11  ;;  %v448_v35 = vmul.f32 %v1934_v22, %v286_v10 }
  0x93   : > { %v449_v36 = vmul.f32 %v1936_v23, %v286_v10 }
  0x95   : > { %v291_v15 = vpop.permute.xlu1 %290  ;;  %v281_v16 = vpop.permute.xlu0 %280 }
  0x96   : > { %v446_v37 = vmul.f32 %v1934_v22, %v281_v16  ;;  %v447_v38 = vmul.f32 %v1936_v23, %v281_v16  ;;  %v450_v45 = vmul.f32 %v1934_v22, %v291_v15  ;;  %v451_v46 = vmul.f32 %v1936_v23, %v291_v15 }
  0x99   : > { %v301_v20 = vpop.permute.xlu1 %300  ;;  %v296_v21 = vpop.permute.xlu0 %295 }
  0x9a   : > { %v452_v51 = vmul.f32 %v1934_v22, %v296_v21  ;;  %v453_v52 = vmul.f32 %v1936_v23, %v296_v21  ;;  %v454_v59 = vmul.f32 %v1934_v22, %v301_v20  ;;  %v455_v60 = vmul.f32 %v1936_v23, %v301_v20 }
  0x9d   : > { %v311_v24 = vpop.permute.xlu1 %310  ;;  %v306_v25 = vpop.permute.xlu0 %305 }
  0x9e   : > { %v456_v13 = vmul.f32 %v1934_v22, %v306_v25  ;;  %v457_v14 = vmul.f32 %v1936_v23, %v306_v25  ;;  %v458_v17 = vmul.f32 %v1934_v22, %v311_v24  ;;  %v459_v18 = vmul.f32 %v1936_v23, %v311_v24 }
  0xa1   : > { %v1940_v29 = vpop.permute.xlu0 %315  ;;  %v511_v30 = vpop.permute.xlu1 %510 }
  0xa2   : > { %v668_v31 = vadd.f32 %v511_v30, %v444_v27  ;;  %v669_v32 = vadd.f32 %v511_v30, %v445_v28 }
  0xa4   : > { %v1953_v47 = vadd.f32 %v1942_v33, %v668_v31  ;;  %v1956_v48 = vadd.f32 %v1944_v34, %v669_v32 }
  0xa5   : > { %v516_v39 = vpop.permute.xlu0 %515  ;;  %v521_v40 = vpop.permute.xlu1 %520 }
  0xa6   : > { %v670_v41 = vadd.f32 %v516_v39, %v446_v37  ;;  %v671_v42 = vadd.f32 %v516_v39, %v447_v38  ;;  %v672_v43 = vadd.f32 %v521_v40, %v448_v35  ;;  %v673_v44 = vadd.f32 %v521_v40, %v449_v36 }
  0xa8   : > { %v1959_v49 = vadd.f32 %v1942_v33, %v672_v43  ;;  %v1962_v50 = vadd.f32 %v1944_v34, %v673_v44  ;;  %v1973_v63 = vadd.f32 %v1942_v33, %v670_v41  ;;  %v1976_v0 = vadd.f32 %v1944_v34, %v671_v42 }
  0xa9   : > { %v526_v53 = vpop.permute.xlu0 %525  ;;  %v531_v54 = vpop.permute.xlu1 %530  ;;  %v460_v42 = vmul.f32 %v1934_v22, %v1940_v29  ;;  %v461_v43 = vmul.f32 %v1936_v23, %v1940_v29 }
  0xaa   : > { %v807_v55 = vmax.f32 %v1953_v47, %v1959_v49  ;;  %v844_v56 = vmax.f32 %v1956_v48, %v1962_v50  ;;  %v674_v57 = vadd.f32 %v526_v53, %v450_v45  ;;  %v675_v58 = vadd.f32 %v526_v53, %v451_v46 }
  0xab   : > { %v676_v61 = vadd.f32 %v531_v54, %v452_v51  ;;  %v677_v62 = vadd.f32 %v531_v54, %v453_v52 }
  0xac   : > { %v1979_v1 = vadd.f32 %v1942_v33, %v674_v57  ;;  %v1982_v2 = vadd.f32 %v1944_v34, %v675_v58 }
  0xad   : > { %v1985_v3 = vadd.f32 %v1942_v33, %v676_v61  ;;  %v1988_v4 = vadd.f32 %v1944_v34, %v677_v62  ;;  %v536_v5 = vpop.permute.xlu0 %535  ;;  %v321_v6 = vpop.permute.xlu1 %320 }
  0xae   : > { %v808_v7 = vmax.f32 %v1973_v63, %v1979_v1  ;;  %v845_v8 = vmax.f32 %v1976_v0, %v1982_v2  ;;  %v678_v9 = vadd.f32 %v536_v5, %v454_v59  ;;  %v679_v10 = vadd.f32 %v536_v5, %v455_v60 }
  0xaf   : > { %v809_v11 = vmax.f32 %v807_v55, %v1985_v3  ;;  %v846_v12 = vmax.f32 %v844_v56, %v1988_v4  ;;  %v462_v44 = vmul.f32 %v1934_v22, %v321_v6  ;;  %v463_v45 = vmul.f32 %v1936_v23, %v321_v6 }
  0xb0   : > { %v1999_v15 = vadd.f32 %v1942_v33, %v678_v9  ;;  %v2002_v16 = vadd.f32 %v1944_v34, %v679_v10 }
  0xb1   : > { %v541_v19 = vpop.permute.xlu0 %540  ;;  %v546_v20 = vpop.permute.xlu1 %545 }
  0xb2   : > { %3044 = vst [vmem:[#allocation5_spill] sm:$0xff] %v2002_v16  ;;  %v810_v21 = vmax.f32 %v808_v7, %v1999_v15  ;;  %v847_v26 = vmax.f32 %v845_v8, %v2002_v16  ;;  %v680_v27 = vadd.f32 %v541_v19, %v456_v13  ;;  %v681_v28 = vadd.f32 %v541_v19, %v457_v14 }
  0xb3   : > { %v682_v30 = vadd.f32 %v546_v20, %v458_v17  ;;  %v683_v25 = vadd.f32 %v546_v20, %v459_v18 }
  0xb4   : > { %v2009_v31 = vadd.f32 %v1942_v33, %v680_v27  ;;  %v2012_v32 = vadd.f32 %v1944_v34, %v681_v28 }
  0xb5   : > { %v2015_v35 = vadd.f32 %v1942_v33, %v682_v30  ;;  %v2018_v24 = vadd.f32 %v1944_v34, %v683_v25  ;;  %v326_v36 = vpop.permute.xlu0 %325  ;;  %v331_v37 = vpop.permute.xlu1 %330 }
  0xb6   : > { %3045 = vst [vmem:[#allocation6_spill] sm:$0xff] %v2009_v31  ;;  %3046 = vst [vmem:[#allocation7_spill] sm:$0xff] %v2012_v32  ;;  %v811_v38 = vmax.f32 %v809_v11, %v2009_v31  ;;  %v848_v39 = vmax.f32 %v846_v12, %v2012_v32  ;;  %v464_v7 = vmul.f32 %v1934_v22, %v326_v36 }
  0xb7   : > { %3047 = vst [vmem:[#allocation8_spill] sm:$0xff] %v2015_v35  ;;  %3048 = vst [vmem:[#allocation9_spill] sm:$0xff] %v2018_v24  ;;  %v812_v40 = vmax.f32 %v810_v21, %v2015_v35  ;;  %v849_v41 = vmax.f32 %v847_v26, %v2018_v24  ;;  %v465_v8 = vmul.f32 %v1936_v23, %v326_v36 }
  0xb8   : > { %v466_v9 = vmul.f32 %v1934_v22, %v331_v37  ;;  %v467_v10 = vmul.f32 %v1936_v23, %v331_v37 }
  0xb9   : > { %v551_v46 = vpop.permute.xlu0 %550  ;;  %v556_v51 = vpop.permute.xlu1 %555 }
  0xba   : > { %v684_v52 = vadd.f32 %v551_v46, %v460_v42  ;;  %v685_v53 = vadd.f32 %v551_v46, %v461_v43  ;;  %v686_v54 = vadd.f32 %v556_v51, %v462_v44  ;;  %v687_v55 = vadd.f32 %v556_v51, %v463_v45 }
  0xbc   : > { %v2031_v56 = vadd.f32 %v1942_v33, %v684_v52  ;;  %v2034_v57 = vadd.f32 %v1944_v34, %v685_v53  ;;  %v2037_v58 = vadd.f32 %v1942_v33, %v686_v54  ;;  %v2040_v29 = vadd.f32 %v1944_v34, %v687_v55 }
  0xbd   : > { %v336_v59 = vpop.permute.xlu0 %335  ;;  %v341_v60 = vpop.permute.xlu1 %340 }
  0xbe   : > { %3049 = vst [vmem:[#allocation10_spill] sm:$0xff] %v2031_v56  ;;  %3050 = vst [vmem:[#allocation11_spill] sm:$0xff] %v2034_v57  ;;  %v2043_v61 = vmax.f32 %v811_v38, %v2031_v56  ;;  %v2046_v62 = vmax.f32 %v848_v39, %v2034_v57  ;;  %v2049_v5 = vmax.f32 %v812_v40, %v2037_v58 }
  0xbf   : > { %3051 = vst [vmem:[#allocation12_spill] sm:$0xff] %v2037_v58  ;;  %3052 = vst [vmem:[#allocation13_spill] sm:$0xff] %v2040_v29  ;;  %v2052_v6 = vmax.f32 %v849_v41, %v2040_v29 }
  0xc1   : > { %v561_v11 = vpop.permute.xlu0 %560  ;;  %v566_v12 = vpop.permute.xlu1 %565 }
  0xc2   : > { %v688_v13 = vadd.f32 %v561_v11, %v464_v7  ;;  %v689_v14 = vadd.f32 %v561_v11, %v465_v8  ;;  %v690_v17 = vadd.f32 %v566_v12, %v466_v9  ;;  %v691_v18 = vadd.f32 %v566_v12, %v467_v10 }
  0xc3   : > { %v470_v7 = vmul.f32 %v1934_v22, %v341_v60  ;;  %v471_v8 = vmul.f32 %v1936_v23, %v341_v60 }
  0xc4   : > { %v2059_v19 = vadd.f32 %v1942_v33, %v688_v13  ;;  %v2062_v20 = vadd.f32 %v1944_v34, %v689_v14  ;;  %v2065_v21 = vadd.f32 %v1942_v33, %v690_v17  ;;  %v2068_v26 = vadd.f32 %v1944_v34, %v691_v18 }
  0xc5   : > { %v346_v27 = vpop.permute.xlu0 %345  ;;  %v351_v28 = vpop.permute.xlu1 %350 }
  0xc6   : > { %3053 = vst [vmem:[#allocation14_spill] sm:$0xff] %v2059_v19  ;;  %3054 = vst [vmem:[#allocation15_spill] sm:$0xff] %v2062_v20  ;;  %v815_v30 = vmax.f32 %v2043_v61, %v2059_v19  ;;  %v852_v25 = vmax.f32 %v2046_v62, %v2062_v20  ;;  %v816_v36 = vmax.f32 %v2049_v5, %v2065_v21 }
  0xc7   : > { %3055 = vst [vmem:[#allocation16_spill] sm:$0xff] %v2065_v21  ;;  %3056 = vst [vmem:[#allocation17_spill] sm:$0xff] %v2068_v26  ;;  %v853_v37 = vmax.f32 %v2052_v6, %v2068_v26  ;;  %v468_v5 = vmul.f32 %v1934_v22, %v336_v59  ;;  %v469_v6 = vmul.f32 %v1936_v23, %v336_v59 }
  0xc8   : > { %v472_v11 = vmul.f32 %v1934_v22, %v346_v27  ;;  %v473_v12 = vmul.f32 %v1936_v23, %v346_v27  ;;  %v474_v13 = vmul.f32 %v1934_v22, %v351_v28  ;;  %v475_v14 = vmul.f32 %v1936_v23, %v351_v28 }
  0xc9   : > { %v571_v38 = vpop.permute.xlu0 %570  ;;  %v576_v39 = vpop.permute.xlu1 %575 }
  0xca   : > { %v692_v17 = vadd.f32 %v571_v38, %v468_v5  ;;  %v693_v18 = vadd.f32 %v571_v38, %v469_v6  ;;  %v694_v26 = vadd.f32 %v576_v39, %v470_v7  ;;  %v695_v59 = vadd.f32 %v576_v39, %v471_v8 }
  0xcc   : > { %v2103_v57 = vadd.f32 %v1942_v33, %v692_v17  ;;  %v2106_v27 = vadd.f32 %v1944_v34, %v693_v18  ;;  %v2109_v28 = vadd.f32 %v1942_v33, %v694_v26  ;;  %v2112_v38 = vadd.f32 %v1944_v34, %v695_v59 }
  0xcd   : > { %v356_v40 = vpop.permute.xlu0 %355  ;;  %v361_v41 = vpop.permute.xlu1 %360 }
  0xce   : > { %v476_v39 = vmul.f32 %v1934_v22, %v356_v40  ;;  %v479_v5 = vmul.f32 %v1936_v23, %v361_v41  ;;  %v854_v59 = vmax.f32 %v852_v25, %v2106_v27  ;;  %v855_v56 = vmax.f32 %v853_v37, %v2112_v38 }
  0xd1   : > { %v581_v42 = vpop.permute.xlu0 %580  ;;  %v586_v43 = vpop.permute.xlu1 %585 }
  0xd2   : > { %v696_v21 = vadd.f32 %v581_v42, %v472_v11  ;;  %v697_v20 = vadd.f32 %v581_v42, %v473_v12  ;;  %v698_v19 = vadd.f32 %v586_v43, %v474_v13  ;;  %v699_v60 = vadd.f32 %v586_v43, %v475_v14 }
  0xd3   : > { %v477_v42 = vmul.f32 %v1936_v23, %v356_v40  ;;  %v478_v43 = vmul.f32 %v1934_v22, %v361_v41 }
  0xd4   : > { %v2119_v6 = vadd.f32 %v1942_v33, %v696_v21  ;;  %v2122_v7 = vadd.f32 %v1944_v34, %v697_v20  ;;  %v2125_v26 = vadd.f32 %v1942_v33, %v698_v19  ;;  %v2128_v8 = vadd.f32 %v1944_v34, %v699_v60 }
  0xd5   : > { %v366_v44 = vpop.permute.xlu0 %365  ;;  %v371_v45 = vpop.permute.xlu1 %370  ;;  %v817_v19 = vmax.f32 %v815_v30, %v2103_v57  ;;  %v818_v60 = vmax.f32 %v816_v36, %v2109_v28 }
  0xd6   : > { %3057 = vst [vmem:[#allocation18_spill] sm:$0xff] %v2122_v7  ;;  %3058 = vst [vmem:[#allocation19_spill] sm:$0xff] %v2125_v26  ;;  %v480_v40 = vmul.f32 %v1934_v22, %v366_v44  ;;  %v481_v13 = vmul.f32 %v1936_v23, %v366_v44  ;;  %v482_v41 = vmul.f32 %v1934_v22, %v371_v45 }
  0xd7   : > { %3059 = vst [vmem:[#allocation20_spill] sm:$0xff] %v2128_v8  ;;  %v483_v21 = vmul.f32 %v1936_v23, %v371_v45  ;;  %v819_v45 = vmax.f32 %v817_v19, %v2119_v6  ;;  %v857_v30 = vmax.f32 %v855_v56, %v2128_v8 }
  0xd9   : > { %v591_v46 = vpop.permute.xlu0 %590  ;;  %v596_v51 = vpop.permute.xlu1 %595 }
  0xda   : > { %v700_v14 = vadd.f32 %v591_v46, %v476_v39  ;;  %v701_v17 = vadd.f32 %v591_v46, %v477_v42  ;;  %v702_v20 = vadd.f32 %v596_v51, %v478_v43  ;;  %v703_v18 = vadd.f32 %v596_v51, %v479_v5 }
  0xdb   : > { %v856_v46 = vmax.f32 %v854_v59, %v2122_v7  ;;  %v820_v51 = vmax.f32 %v818_v60, %v2125_v26 }
  0xdc   : > { %v2143_v25 = vadd.f32 %v1942_v33, %v700_v14  ;;  %v2146_v36 = vadd.f32 %v1944_v34, %v701_v17  ;;  %v2149_v37 = vadd.f32 %v1942_v33, %v702_v20 }
  0xdd   : > { %v2078_v52 = vpop.permute.xlu0 %375  ;;  %v2080_v53 = vpop.permute.xlu1 %380 }
  0xde   : > { %3060 = vst [vmem:[#allocation21_spill] sm:$0xff] %v2143_v25  ;;  %3061 = vst [vmem:[#allocation22_spill] sm:$0xff] %v2146_v36  ;;  %v485_v39 = vmul.f32 %v1936_v23, %v2078_v52  ;;  %v486_v56 = vmul.f32 %v1934_v22, %v2080_v53  ;;  %v487_v42 = vmul.f32 %v1936_v23, %v2080_v53 }
  0xdf   : > { %3062 = vst [vmem:[#allocation23_spill] sm:$0xff] %v2149_v37  ;;  %v858_v19 = vmax.f32 %v856_v46, %v2146_v36 }
  0xe1   : > { %v601_v54 = vpop.permute.xlu0 %600  ;;  %v606_v55 = vpop.permute.xlu1 %605 }
  0xe2   : > { %v704_v24 = vadd.f32 %v601_v54, %v480_v40  ;;  %v705_v35 = vadd.f32 %v601_v54, %v481_v13  ;;  %v706_v32 = vadd.f32 %v606_v55, %v482_v41  ;;  %v707_v44 = vadd.f32 %v606_v55, %v483_v21 }
  0xe3   : > { %v2152_v54 = vadd.f32 %v1944_v34, %v703_v18  ;;  %v484_v55 = vmul.f32 %v1934_v22, %v2078_v52  ;;  %v821_v18 = vmax.f32 %v819_v45, %v2143_v25 }
  0xe4   : > { %v2163_v43 = vadd.f32 %v1942_v33, %v704_v24  ;;  %v2166_v5 = vadd.f32 %v1944_v34, %v705_v35  ;;  %v2169_v40 = vadd.f32 %v1942_v33, %v706_v32  ;;  %v2172_v13 = vadd.f32 %v1944_v34, %v707_v44 }
  0xe5   : > { %v2082_v61 = vpop.permute.xlu0 %385  ;;  %v2084_v62 = vpop.permute.xlu1 %390  ;;  %3063 = vst [vmem:[#allocation24_spill] sm:$0xff] %v2152_v54  ;;  %v859_v59 = vmax.f32 %v857_v30, %v2152_v54 }
  0xe6   : > { %3064 = vst [vmem:[#allocation25_spill] sm:$0xff] %v2163_v43  ;;  %3065 = vst [vmem:[#allocation26_spill] sm:$0xff] %v2166_v5  ;;  %v488_v21 = vmul.f32 %v1934_v22, %v2082_v61  ;;  %v489_v53 = vmul.f32 %v1936_v23, %v2082_v61  ;;  %v490_v24 = vmul.f32 %v1934_v22, %v2084_v62 }
  0xe7   : > { %v491_v35 = vmul.f32 %v1936_v23, %v2084_v62  ;;  %v822_v61 = vmax.f32 %v820_v51, %v2149_v37  ;;  %v861_v45 = vmax.f32 %v859_v59, %v2172_v13 }
  0xe9   : > { %v2090_v9 = vpop.permute.xlu0 %610  ;;  %v2092_v10 = vpop.permute.xlu1 %615 }
  0xea   : > { %v708_v32 = vadd.f32 %v2090_v9, %v484_v55  ;;  %v709_v14 = vadd.f32 %v2090_v9, %v485_v39  ;;  %v710_v17 = vadd.f32 %v2092_v10, %v486_v56  ;;  %v711_v20 = vadd.f32 %v2092_v10, %v487_v42 }
  0xeb   : > { %v823_v9 = vmax.f32 %v821_v18, %v2163_v43  ;;  %v860_v39 = vmax.f32 %v858_v19, %v2166_v5  ;;  %v824_v10 = vmax.f32 %v822_v61, %v2169_v40 }
  0xec   : > { %v2195_v46 = vadd.f32 %v1942_v33, %v708_v32  ;;  %v2198_v51 = vadd.f32 %v1944_v34, %v709_v14 }
  0xed   : > { %v2098_v29 = vpop.permute.xlu0 %395  ;;  %v2100_v58 = vpop.permute.xlu1 %400 }
  0xee   : > { %v492_v30 = vmul.f32 %v1934_v22, %v2098_v29  ;;  %v493_v56 = vmul.f32 %v1936_v23, %v2098_v29  ;;  %v494_v42 = vmul.f32 %v1934_v22, %v2100_v58 }
  0xf1   : > { %v621_v11 = vpop.permute.xlu0 %620  ;;  %v626_v12 = vpop.permute.xlu1 %625 }
  0xf2   : > { %v712_v60 = vadd.f32 %v621_v11, %v488_v21  ;;  %v713_v44 = vadd.f32 %v621_v11, %v489_v53  ;;  %v714_v8 = vadd.f32 %v626_v12, %v490_v24  ;;  %v715_v62 = vadd.f32 %v626_v12, %v491_v35 }
  0xf3   : > { %v2201_v11 = vadd.f32 %v1942_v33, %v710_v17  ;;  %v2204_v12 = vadd.f32 %v1944_v34, %v711_v20  ;;  %v495_v21 = vmul.f32 %v1936_v23, %v2100_v58 }
  0xf4   : > { %v2215_v53 = vadd.f32 %v1942_v33, %v712_v60  ;;  %v2218_v24 = vadd.f32 %v1944_v34, %v713_v44  ;;  %v2221_v35 = vadd.f32 %v1942_v33, %v714_v8  ;;  %v2224_v32 = vadd.f32 %v1944_v34, %v715_v62 }
  0xf5   : > { %v406_v31 = vpop.permute.xlu0 %405  ;;  %v411_v16 = vpop.permute.xlu1 %410  ;;  %v825_v8 = vmax.f32 %v823_v9, %v2195_v46  ;;  %v862_v44 = vmax.f32 %v860_v39, %v2198_v51  ;;  %v826_v62 = vmax.f32 %v824_v10, %v2201_v11  ;;  %v863_v5 = vmax.f32 %v861_v45, %v2204_v12 }
  0xf6   : > { %v496_v17 = vmul.f32 %v1934_v22, %v406_v31  ;;  %v497_v20 = vmul.f32 %v1936_v23, %v406_v31  ;;  %v498_v58 = vmul.f32 %v1934_v22, %v411_v16  ;;  %v499_v18 = vmul.f32 %v1936_v23, %v411_v16 }
  0xf7   : > { %v827_v16 = vmax.f32 %v825_v8, %v2215_v53  ;;  %v865_v9 = vmax.f32 %v863_v5, %v2224_v32 }
  0xf9   : > { %v631_v41 = vpop.permute.xlu0 %630  ;;  %v636_v52 = vpop.permute.xlu1 %635 }
  0xfa   : > { %v716_v19 = vadd.f32 %v631_v41, %v492_v30  ;;  %v717_v61 = vadd.f32 %v631_v41, %v493_v56  ;;  %v718_v59 = vadd.f32 %v636_v52, %v494_v42  ;;  %v719_v60 = vadd.f32 %v636_v52, %v495_v21 }
  0xfb   : > { %v864_v41 = vmax.f32 %v862_v44, %v2218_v24  ;;  %v828_v52 = vmax.f32 %v826_v62, %v2221_v35 }
  0xfc   : > { %v2239_v39 = vadd.f32 %v1942_v33, %v716_v19  ;;  %v2242_v10 = vadd.f32 %v1944_v34, %v717_v61  ;;  %v2245_v45 = vadd.f32 %v1942_v33, %v718_v59  ;;  %v2248_v30 = vadd.f32 %v1944_v34, %v719_v60 }
  0xfd   : > { %v416_v26 = vpop.permute.xlu0 %415  ;;  %v421_v55 = vpop.permute.xlu1 %420 }
  0xfe   : > { %v500_v56 = vmul.f32 %v1934_v22, %v416_v26  ;;  %v501_v42 = vmul.f32 %v1936_v23, %v416_v26  ;;  %v502_v21 = vmul.f32 %v1934_v22, %v421_v55  ;;  %v503_v5 = vmul.f32 %v1936_v23, %v421_v55 }
  0xff   : > { %v829_v55 = vmax.f32 %v827_v16, %v2239_v39  ;;  %v830_v60 = vmax.f32 %v828_v52, %v2245_v45 }
 0x101   : > { %v641_v14 = vpop.permute.xlu0 %640  ;;  %v646_v29 = vpop.permute.xlu1 %645 }
 0x102   : > { %v720_v43 = vadd.f32 %v641_v14, %v496_v17  ;;  %v721_v54 = vadd.f32 %v641_v14, %v497_v20  ;;  %v722_v37 = vadd.f32 %v646_v29, %v498_v58  ;;  %v723_v31 = vadd.f32 %v646_v29, %v499_v18 }
 0x104   : > { %v2255_v14 = vadd.f32 %v1942_v33, %v720_v43  ;;  %v2258_v29 = vadd.f32 %v1944_v34, %v721_v54  ;;  %v2261_v17 = vadd.f32 %v1942_v33, %v722_v37  ;;  %v2264_v20 = vadd.f32 %v1944_v34, %v723_v31 }
 0x105   : > { %v426_v36 = vpop.permute.xlu0 %425  ;;  %v431_v25 = vpop.permute.xlu1 %430  ;;  %v866_v43 = vmax.f32 %v864_v41, %v2242_v10  ;;  %v867_v54 = vmax.f32 %v865_v9, %v2248_v30 }
 0x106   : > { %3066 = vst [vmem:[#allocation27_spill] sm:$0xff] %v2264_v20  ;;  %v504_v31 = vmul.f32 %v1934_v22, %v426_v36  ;;  %v505_v16 = vmul.f32 %v1936_v23, %v426_v36  ;;  %v506_v41 = vmul.f32 %v1934_v22, %v431_v25  ;;  %v507_v52 = vmul.f32 %v1936_v23, %v431_v25 }
 0x109   : > { %v651_v58 = vpop.permute.xlu0 %650  ;;  %v656_v18 = vpop.permute.xlu1 %655 }
 0x10a   : > { %v724_v19 = vadd.f32 %v651_v58, %v500_v56  ;;  %v725_v26 = vadd.f32 %v651_v58, %v501_v42  ;;  %v726_v61 = vadd.f32 %v656_v18, %v502_v21  ;;  %v727_v59 = vadd.f32 %v656_v18, %v503_v5 }
 0x10b   : > { %v831_v56 = vmax.f32 %v829_v55, %v2255_v14  ;;  %v868_v42 = vmax.f32 %v866_v43, %v2258_v29  ;;  %v832_v21 = vmax.f32 %v830_v60, %v2261_v17  ;;  %v869_v5 = vmax.f32 %v867_v54, %v2264_v20 }
 0x10c   : > { %v2271_v37 = vadd.f32 %v1942_v33, %v724_v19  ;;  %v2274_v8 = vadd.f32 %v1944_v34, %v725_v26  ;;  %v2277_v44 = vadd.f32 %v1942_v33, %v726_v61  ;;  %v2280_v62 = vadd.f32 %v1944_v34, %v727_v59 }
 0x10d   : > { %v661_v9 = vpop.permute.xlu0 %660  ;;  %v666_v58 = vpop.permute.xlu1 %665 }
 0x10e   : > { %3067 = vst [vmem:[#allocation28_spill] sm:$0xff] %v2271_v37  ;;  %3068 = vst [vmem:[#allocation29_spill] sm:$0xff] %v2274_v8  ;;  %v728_v18 = vadd.f32 %v661_v9, %v504_v31  ;;  %v729_v19 = vadd.f32 %v661_v9, %v505_v16  ;;  %v730_v26 = vadd.f32 %v666_v58, %v506_v41 }
 0x10f   : > { %v731_v61 = vadd.f32 %v666_v58, %v507_v52  ;;  %v833_v36 = vmax.f32 %v831_v56, %v2271_v37  ;;  %v870_v22 = vmax.f32 %v868_v42, %v2274_v8  ;;  %v834_v23 = vmax.f32 %v832_v21, %v2277_v44 }
 0x110   : > { %v871_v25 = vmax.f32 %v869_v5, %v2280_v62  ;;  %v2295_v59 = vadd.f32 %v1942_v33, %v728_v18  ;;  %v2298_v55 = vadd.f32 %v1944_v34, %v729_v19  ;;  %v2301_v43 = vadd.f32 %v1942_v33, %v730_v26 }
 0x111   : > { %v2304_v60 = vadd.f32 %v1944_v34, %v731_v61 }
 0x112   : > { %3069 = vst [vmem:[#allocation30_spill] sm:$0xff] %v2295_v59  ;;  %3070 = vst [vmem:[#allocation31_spill] sm:$0xff] %v2298_v55  ;;  %v835_v54 = vmax.f32 %v833_v36, %v2295_v59  ;;  %v872_v31 = vmax.f32 %v870_v22, %v2298_v55  ;;  %v836_v16 = vmax.f32 %v834_v23, %v2301_v43 }
 0x113   : > { %v873_v41 = vmax.f32 %v871_v25, %v2304_v60 }
 0x114   : > { %v837_v52 = vmax.f32 %v835_v54, %v836_v16 }
 0x115   : > { %v874_v9 = vmax.f32 %v872_v31, %v873_v41 }
 0x116   : > { %v838_v56 = vrot.slane %v837_v52, 4 }
 0x117   : > { %v875_v42 = vrot.slane %v874_v9, 4 }
 0x118   : > { %v839_v21 = vmax.f32 %v837_v52, %v838_v56 }
 0x119   : > { %v876_v5 = vmax.f32 %v874_v9, %v875_v42 }
 0x11a   : > { %v840_v58 = vrot.slane %v839_v21, 2 }
 0x11b   : > { %v877_v33 = vrot.slane %v876_v5, 2 }
 0x11c   : > { %v841_v18 = vmax.f32 %v839_v21, %v840_v58 }
 0x11d   : > { %v878_v19 = vmax.f32 %v876_v5, %v877_v33  ;;  %v3078_v33 = vld [vmem:[#allocation12_spill] sm:$0xff]  ;;  %v3083_v5 = vld [vmem:[#allocation17_spill] sm:$0xff] }
 0x11e   : > { %v842_v34 = vrot.slane %v841_v18, 1 }
 0x11f   : > { %v879_v26 = vrot.slane %v878_v19, 1 }
 0x120   : > { %v2310_v61 = vmax.f32 %v841_v18, %v842_v34 }
 0x121   : > { %v2312_v36 = vmax.f32 %v878_v19, %v879_v26  ;;  %v3079_v19 = vld [vmem:[#allocation13_spill] sm:$0xff]  ;;  %v3080_v26 = vld [vmem:[#allocation14_spill] sm:$0xff] }
 0x122   : > { %v881_v22 = vsub.f32 %v1953_v47, %v2310_v61  ;;  %v883_v25 = vsub.f32 %v1973_v63, %v2310_v61  ;;  %v885_v31 = vsub.f32 %v1959_v49, %v2310_v61  ;;  %v887_v41 = vsub.f32 %v1979_v1, %v2310_v61  ;;  %v3071_v49 = vld [vmem:[#allocation5_spill] sm:$0xff]  ;;  %v3073_v1 = vld [vmem:[#allocation7_spill] sm:$0xff] }
 0x123   : > { %v882_v23 = vsub.f32 %v1956_v48, %v2312_v36  ;;  %v884_v54 = vsub.f32 %v1976_v0, %v2312_v36  ;;  %v886_v16 = vsub.f32 %v1962_v50, %v2312_v36  ;;  %v888_v47 = vsub.f32 %v1982_v2, %v2312_v36  ;;  %v3072_v50 = vld [vmem:[#allocation6_spill] sm:$0xff]  ;;  %v3074_v2 = vld [vmem:[#allocation8_spill] sm:$0xff] }
 0x124   : > { %v889_v48 = vsub.f32 %v1985_v3, %v2310_v61  ;;  %v890_v63 = vsub.f32 %v1988_v4, %v2312_v36  ;;  %v891_v0 = vsub.f32 %v1999_v15, %v2310_v61  ;;  %v892_v52 = vsub.f32 %v3071_v49, %v2312_v36  ;;  %v3075_v3 = vld [vmem:[#allocation9_spill] sm:$0xff]  ;;  %v3076_v4 = vld [vmem:[#allocation10_spill] sm:$0xff]  ;;  %v3077_v15 = vld [vmem:[#allocation11_spill] sm:$0xff] }
 0x125   : > { %v893_v9 = vsub.f32 %v3072_v50, %v2310_v61  ;;  %v894_v56 = vsub.f32 %v3073_v1, %v2312_v36  ;;  %v895_v42 = vsub.f32 %v3074_v2, %v2310_v61  ;;  %v896_v21 = vsub.f32 %v3075_v3, %v2312_v36  ;;  %v3081_v50 = vld [vmem:[#allocation15_spill] sm:$0xff]  ;;  %v3082_v2 = vld [vmem:[#allocation16_spill] sm:$0xff] }
 0x126   : > { %v945_v37 = vmul.f32 1.442695, %v881_v22  ;;  %v947_v3 = vmul.f32 1.442695, %v882_v23  ;;  %v949_v8 = vmul.f32 1.442695, %v883_v25 }
 0x127   : > { %v951_v20 = vmul.f32 1.442695, %v884_v54  ;;  %v953_v58 = vmul.f32 1.442695, %v885_v31  ;;  %v955_v7 = vmul.f32 1.442695, %v886_v16 }
 0x128   : > { %1448 = vpow2.f32 %v945_v37  ;;  %v957_v18 = vmul.f32 1.442695, %v887_v41  ;;  %v959_v59 = vmul.f32 1.442695, %v888_v47  ;;  %v961_v34 = vmul.f32 1.442695, %v889_v48 }
 0x129   : > { %1450 = vpow2.f32 %v947_v3  ;;  %v963_v55 = vmul.f32 1.442695, %v890_v63  ;;  %v965_v49 = vmul.f32 1.442695, %v891_v0  ;;  %v967_v1 = vmul.f32 1.442695, %v892_v52 }
 0x12a   : > { %1452 = vpow2.f32 %v949_v8  ;;  %v969_v22 = vmul.f32 1.442695, %v893_v9  ;;  %v971_v23 = vmul.f32 1.442695, %v894_v56  ;;  %v973_v37 = vmul.f32 1.442695, %v895_v42 }
 0x12b   : > { %1454 = vpow2.f32 %v951_v20  ;;  %v975_v20 = vmul.f32 1.442695, %v896_v21  ;;  %v3086_v41 = vsub.f32 %v3078_v33, %v2310_v61  ;;  %v3087_v48 = vsub.f32 %v3079_v19, %v2312_v36  ;;  %v3092_v3 = vld [vmem:[#allocation18_spill] sm:$0xff] }
 0x12c   : > { %1456 = vpow2.f32 %v953_v58  ;;  %v905_v0 = vsub.f32 %v2103_v57, %v2310_v61  ;;  %v906_v52 = vsub.f32 %v2106_v27, %v2312_v36  ;;  %v3088_v9 = vsub.f32 %v3080_v26, %v2310_v61 }
 0x12d   : > { %1458 = vpow2.f32 %v955_v7  ;;  %v3084_v7 = vsub.f32 %v3076_v4, %v2310_v61  ;;  %v981_v47 = vmul.f32 1.442695, %v3086_v41  ;;  %v983_v63 = vmul.f32 1.442695, %v3087_v48 }
 0x12e   : > { %1460 = vpow2.f32 %v957_v18  ;;  %v985_v56 = vmul.f32 1.442695, %v3088_v9  ;;  %v3089_v21 = vsub.f32 %v3081_v50, %v2312_v36  ;;  %v907_v27 = vsub.f32 %v2109_v28, %v2310_v61  ;;  %v3095_v9 = vld [vmem:[#allocation21_spill] sm:$0xff] }
 0x12f   : > { %1462 = vpow2.f32 %v959_v59  ;;  %v977_v54 = vmul.f32 1.442695, %v3084_v7  ;;  %v3085_v59 = vsub.f32 %v3077_v15, %v2312_v36  ;;  %v908_v33 = vsub.f32 %v2112_v38, %v2312_v36 }
 0x130   : > { %1464 = vpow2.f32 %v961_v34  ;;  %v987_v4 = vmul.f32 1.442695, %v3089_v21  ;;  %v3090_v18 = vsub.f32 %v3082_v2, %v2310_v61  ;;  %v3091_v26 = vsub.f32 %v3083_v5, %v2312_v36  ;;  %v3096_v21 = vld [vmem:[#allocation22_spill] sm:$0xff] }
 0x131   : > { %1466 = vpow2.f32 %v963_v55  ;;  %v979_v55 = vmul.f32 1.442695, %v3085_v59  ;;  %v909_v38 = vsub.f32 %v2119_v6, %v2310_v61  ;;  %v910_v2 = vsub.f32 %v3092_v3, %v2312_v36  ;;  %v3094_v6 = vld [vmem:[#allocation20_spill] sm:$0xff] }
 0x132   : > { %1468 = vpow2.f32 %v965_v49  ;;  %v989_v19 = vmul.f32 1.442695, %v3090_v18  ;;  %v991_v49 = vmul.f32 1.442695, %v3091_v26  ;;  %v997_v41 = vmul.f32 1.442695, %v907_v27 }
 0x133   : > { %1470 = vpow2.f32 %v967_v1  ;;  %v999_v48 = vmul.f32 1.442695, %v908_v33  ;;  %v1003_v27 = vmul.f32 1.442695, %v910_v2  ;;  %v3097_v26 = vld [vmem:[#allocation23_spill] sm:$0xff] }
 0x134   : > { %1472 = vpow2.f32 %v969_v22  ;;  %v993_v22 = vmul.f32 1.442695, %v905_v0 }
 0x135   : > { %v2414_v8 = vpop.eup %1448  ;;  %1474 = vpow2.f32 %v971_v23 }
 0x136   : > { %v2416_v25 = vpop.eup %1450  ;;  %1476 = vpow2.f32 %v973_v37  ;;  %v995_v37 = vmul.f32 1.442695, %v906_v52 }
 0x137   : > { %v2421_v31 = vpop.eup %1452  ;;  %1478 = vpow2.f32 %v975_v20 }
 0x138   : > { %v2426_v16 = vpop.eup %1454  ;;  %1480 = vpow2.f32 %v977_v54  ;;  %v1073_v15 = vadd.f32 %v2421_v31, %v2414_v8  ;;  %v3093_v54 = vld [vmem:[#allocation19_spill] sm:$0xff] }
 0x139   : > { %v2441_v42 = vpop.eup %1456  ;;  %1482 = vpow2.f32 %v979_v55  ;;  %v1110_v57 = vadd.f32 %v2426_v16, %v2416_v25  ;;  %v911_v59 = vsub.f32 %v3093_v54, %v2310_v61  ;;  %v912_v55 = vsub.f32 %v3094_v6, %v2312_v36  ;;  %v3100_v6 = vld [vmem:[#allocation26_spill] sm:$0xff] }
 0x13a   : > { %v2450_v58 = vpop.eup %1458  ;;  %1484 = vpow2.f32 %v981_v47  ;;  %v1074_v50 = vadd.f32 %v2441_v42, %v1073_v15  ;;  %v1001_v15 = vmul.f32 1.442695, %v909_v38 }
 0x13b   : > { %v2459_v34 = vpop.eup %1460  ;;  %1486 = vpow2.f32 %v983_v63  ;;  %v1111_v1 = vadd.f32 %v2450_v58, %v1110_v57  ;;  %v1005_v3 = vmul.f32 1.442695, %v911_v59  ;;  %v1007_v38 = vmul.f32 1.442695, %v912_v55 }
 0x13c   : > { %v2466_v28 = vpop.eup %1462  ;;  %1488 = vpow2.f32 %v985_v56  ;;  %v1075_v5 = vadd.f32 %v2459_v34, %v1074_v50  ;;  %v913_v56 = vsub.f32 %v3095_v9, %v2310_v61  ;;  %v3098_v50 = vld [vmem:[#allocation24_spill] sm:$0xff] }
 0x13d   : > { %v2472_v23 = vpop.eup %1464  ;;  %1490 = vpow2.f32 %v987_v4  ;;  %v1112_v20 = vadd.f32 %v2466_v28, %v1111_v1  ;;  %v914_v4 = vsub.f32 %v3096_v21, %v2312_v36  ;;  %v916_v1 = vsub.f32 %v3098_v50, %v2312_v36 }
 0x13e   : > { %v2476_v7 = vpop.eup %1466  ;;  %1492 = vpow2.f32 %v989_v19  ;;  %v1076_v63 = vadd.f32 %v2472_v23, %v1075_v5 }
 0x13f   : > { %v2482_v47 = vpop.eup %1468  ;;  %1494 = vpow2.f32 %v991_v49  ;;  %v1113_v0 = vadd.f32 %v2476_v7, %v1112_v20  ;;  %v915_v49 = vsub.f32 %v3097_v26, %v2310_v61  ;;  %v3099_v20 = vld [vmem:[#allocation25_spill] sm:$0xff]  ;;  %v1011_v59 = vmul.f32 1.442695, %v914_v4 }
 0x140   : > { %v2486_v52 = vpop.eup %1470  ;;  %1496 = vpow2.f32 %v993_v22  ;;  %v1077_v33 = vadd.f32 %v2482_v47, %v1076_v63  ;;  %v917_v54 = vsub.f32 %v3099_v20, %v2310_v61  ;;  %v918_v63 = vsub.f32 %v3100_v6, %v2312_v36 }
 0x141   : > { %v2492_v57 = vpop.eup %1472  ;;  %1498 = vpow2.f32 %v995_v37  ;;  %v1114_v18 = vadd.f32 %v2486_v52, %v1113_v0  ;;  %v1009_v0 = vmul.f32 1.442695, %v913_v56  ;;  %v1013_v21 = vmul.f32 1.442695, %v915_v49 }
 0x142   : > { %v2496_v19 = vpop.eup %1474  ;;  %1500 = vpow2.f32 %v997_v41  ;;  %v1078_v2 = vadd.f32 %v2492_v57, %v1077_v33  ;;  %v1017_v4 = vmul.f32 1.442695, %v917_v54  ;;  %v1019_v50 = vmul.f32 1.442695, %v918_v63 }
 0x143   : > { %v2502_v22 = vpop.eup %1476  ;;  %1502 = vpow2.f32 %v999_v48  ;;  %v1115_v37 = vadd.f32 %v2496_v19, %v1114_v18  ;;  %v1015_v18 = vmul.f32 1.442695, %v916_v1  ;;  %v3101_v1 = vsub.f32 %v2169_v40, %v2310_v61 }
 0x144   : > { %v2506_v5 = vpop.eup %1478  ;;  %1504 = vpow2.f32 %v1001_v15  ;;  %v1079_v55 = vadd.f32 %v2502_v22, %v1078_v2  ;;  %v3102_v20 = vsub.f32 %v2172_v13, %v2312_v36 }
 0x145   : > { %v2512_v41 = vpop.eup %1480  ;;  %1506 = vpow2.f32 %v1003_v27  ;;  %v1116_v48 = vadd.f32 %v2506_v5, %v1115_v37 }
 0x146   : > { %v2516_v9 = vpop.eup %1482  ;;  %1508 = vpow2.f32 %v1005_v3  ;;  %v1080_v26 = vadd.f32 %v2512_v41, %v1079_v55  ;;  %v1023_v54 = vmul.f32 1.442695, %v3102_v20 }
 0x147   : > { %v2518_v33 = vpop.eup %1484  ;;  %1510 = vpow2.f32 %v1007_v38  ;;  %v1117_v56 = vadd.f32 %v2516_v9, %v1116_v48  ;;  %v1021_v38 = vmul.f32 1.442695, %v3101_v1  ;;  %v3104_v48 = vsub.f32 %v2198_v51, %v2312_v36 }
 0x148   : > { %v2522_v15 = vpop.eup %1486  ;;  %1512 = vpow2.f32 %v1009_v0  ;;  %v1081_v2 = vadd.f32 %v2518_v33, %v1080_v26 }
 0x149   : > { %v2524_v27 = vpop.eup %1488  ;;  %1514 = vpow2.f32 %v1011_v59  ;;  %v1118_v49 = vadd.f32 %v2522_v15, %v1117_v56  ;;  %v3103_v59 = vsub.f32 %v2195_v46, %v2310_v61  ;;  %v3105_v56 = vsub.f32 %v2201_v11, %v2310_v61 }
 0x14a   : > { %v2528_v3 = vpop.eup %1490  ;;  %1516 = vpow2.f32 %v1013_v21  ;;  %v1082_v6 = vadd.f32 %v2524_v27, %v1081_v2  ;;  %v1027_v21 = vmul.f32 1.442695, %v3104_v48 }
 0x14b   : > { %v2533_v37 = vpop.eup %1492  ;;  %1518 = vpow2.f32 %v1015_v18  ;;  %v1119_v63 = vadd.f32 %v2528_v3, %v1118_v49  ;;  %v1025_v55 = vmul.f32 1.442695, %v3103_v59 }
 0x14c   : > { %v2540_v0 = vpop.eup %1494  ;;  %1520 = vpow2.f32 %v1017_v4  ;;  %v1083_v13 = vadd.f32 %v2533_v37, %v1082_v6  ;;  %v1029_v4 = vmul.f32 1.442695, %v3105_v56 }
 0x14d   : > { %v2545_v40 = vpop.eup %1496  ;;  %1522 = vpow2.f32 %v1019_v50  ;;  %v1120_v18 = vadd.f32 %v2540_v0, %v1119_v63  ;;  %v3106_v50 = vsub.f32 %v2204_v12, %v2312_v36 }
 0x14e   : > { %v2552_v26 = vpop.eup %1498  ;;  %1524 = vpow2.f32 %v1021_v38  ;;  %v1084_v51 = vadd.f32 %v2545_v40, %v1083_v13  ;;  %v3107_v38 = vsub.f32 %v2215_v53, %v2310_v61 }
 0x14f   : > { %v2557_v46 = vpop.eup %1500  ;;  %1526 = vpow2.f32 %v1023_v54  ;;  %v1031_v2 = vmul.f32 1.442695, %v3106_v50  ;;  %v1121_v49 = vadd.f32 %v2552_v26, %v1120_v18  ;;  %v3108_v54 = vsub.f32 %v2218_v24, %v2312_v36 }
 0x150   : > { %v2564_v1 = vpop.eup %1502  ;;  %1528 = vpow2.f32 %v1025_v55  ;;  %v1033_v20 = vmul.f32 1.442695, %v3107_v38  ;;  %v1085_v12 = vadd.f32 %v2557_v46, %v1084_v51  ;;  %v3109_v55 = vsub.f32 %v2221_v35, %v2310_v61 }
 0x151   : > { %v2569_v11 = vpop.eup %1504  ;;  %1530 = vpow2.f32 %v1027_v21  ;;  %v1035_v6 = vmul.f32 1.442695, %v3108_v54  ;;  %v1122_v63 = vadd.f32 %v2564_v1, %v1121_v49  ;;  %v3110_v21 = vsub.f32 %v2224_v32, %v2312_v36 }
 0x152   : > { %v2576_v59 = vpop.eup %1506  ;;  %1532 = vpow2.f32 %v1029_v4  ;;  %v1037_v48 = vmul.f32 1.442695, %v3109_v55  ;;  %v1086_v24 = vadd.f32 %v2569_v11, %v1085_v12  ;;  %v3111_v4 = vsub.f32 %v2239_v39, %v2310_v61 }
 0x153   : > { %v2581_v53 = vpop.eup %1508  ;;  %1534 = vpow2.f32 %v1031_v2  ;;  %v1039_v13 = vmul.f32 1.442695, %v3110_v21  ;;  %v1123_v18 = vadd.f32 %v2576_v59, %v1122_v63  ;;  %v3112_v2 = vsub.f32 %v2242_v10, %v2312_v36 }
 0x154   : > { %v2588_v56 = vpop.eup %1510  ;;  %1536 = vpow2.f32 %v1033_v20  ;;  %v1041_v50 = vmul.f32 1.442695, %v3111_v4  ;;  %v1087_v32 = vadd.f32 %v2581_v53, %v1086_v24  ;;  %v3113_v20 = vsub.f32 %v2245_v45, %v2310_v61 }
 0x155   : > { %v2593_v35 = vpop.eup %1512  ;;  %1538 = vpow2.f32 %v1035_v6  ;;  %v1043_v51 = vmul.f32 1.442695, %v3112_v2  ;;  %v1124_v49 = vadd.f32 %v2588_v56, %v1123_v18  ;;  %v3114_v6 = vsub.f32 %v2248_v30, %v2312_v36 }
 0x156   : > { %v2600_v38 = vpop.eup %1514  ;;  %1540 = vpow2.f32 %v1037_v48  ;;  %v1045_v54 = vmul.f32 1.442695, %v3113_v20  ;;  %v1088_v10 = vadd.f32 %v2593_v35, %v1087_v32  ;;  %v3115_v48 = vsub.f32 %v2255_v14, %v2310_v61  ;;  %v3118_v32 = vld [vmem:[#allocation27_spill] sm:$0xff] }
 0x157   : > { %v2605_v39 = vpop.eup %1516  ;;  %1542 = vpow2.f32 %v1039_v13  ;;  %v1047_v12 = vmul.f32 1.442695, %v3114_v6  ;;  %v1125_v63 = vadd.f32 %v2600_v38, %v1124_v49  ;;  %v3116_v13 = vsub.f32 %v2258_v29, %v2312_v36 }
 0x158   : > { %v2612_v55 = vpop.eup %1518  ;;  %1544 = vpow2.f32 %v1041_v50  ;;  %v1049_v21 = vmul.f32 1.442695, %v3115_v48  ;;  %v1089_v30 = vadd.f32 %v2605_v39, %v1088_v10  ;;  %v3117_v50 = vsub.f32 %v2261_v17, %v2310_v61  ;;  %v3121_v10 = vld [vmem:[#allocation28_spill] sm:$0xff]  ;;  %v3123_v48 = vld [vmem:[#allocation29_spill] sm:$0xff] }
 0x159   : > { %v2617_v45 = vpop.eup %1520  ;;  %1546 = vpow2.f32 %v1043_v51  ;;  %v1051_v24 = vmul.f32 1.442695, %v3116_v13  ;;  %v1126_v18 = vadd.f32 %v2612_v55, %v1125_v63  ;;  %v3119_v51 = vsub.f32 %v3118_v32, %v2312_v36 }
 0x15a   : > { %v2624_v4 = vpop.eup %1522  ;;  %1548 = vpow2.f32 %v1045_v54  ;;  %v1053_v2 = vmul.f32 1.442695, %v3117_v50  ;;  %v1090_v29 = vadd.f32 %v2617_v45, %v1089_v30  ;;  %v3122_v54 = vsub.f32 %v3121_v10, %v2310_v61 }
 0x15b   : > { %v2629_v14 = vpop.eup %1524  ;;  %1550 = vpow2.f32 %v1047_v12  ;;  %v1055_v49 = vmul.f32 1.442695, %v3119_v51  ;;  %v1127_v20 = vadd.f32 %v2624_v4, %v1126_v18  ;;  %v3124_v12 = vsub.f32 %v3123_v48, %v2312_v36 }
 0x15c   : > { %v2636_v6 = vpop.eup %1526  ;;  %1552 = vpow2.f32 %v1049_v21  ;;  %v1057_v63 = vmul.f32 1.442695, %v3122_v54  ;;  %v1091_v50 = vadd.f32 %v2629_v14, %v1090_v29  ;;  %v3125_v21 = vsub.f32 %v2277_v44, %v2310_v61 }
 0x15d   : > { %3120 = vst [vmem:[#allocation5_spill] sm:$0xff] %v2636_v6  ;;  %v2641_v17 = vpop.eup %1528  ;;  %1554 = vpow2.f32 %v1051_v24  ;;  %v1059_v13 = vmul.f32 1.442695, %v3124_v12  ;;  %v1128_v30 = vadd.f32 %v2636_v6, %v1127_v20  ;;  %v3126_v24 = vsub.f32 %v2280_v62, %v2312_v36  ;;  %v3128_v20 = vld [vmem:[#allocation30_spill] sm:$0xff] }
 0x15e   : > { %v2648_v32 = vpop.eup %1530  ;;  %1556 = vpow2.f32 %v1053_v2  ;;  %v1061_v18 = vmul.f32 1.442695, %v3125_v21  ;;  %v1092_v54 = vadd.f32 %v2641_v17, %v1091_v50  ;;  %v3129_v2 = vsub.f32 %v3128_v20, %v2310_v61  ;;  %v3131_v21 = vld [vmem:[#allocation31_spill] sm:$0xff] }
 0x15f   : > { %v2653_v51 = vpop.eup %1532  ;;  %1558 = vpow2.f32 %v1055_v49  ;;  %v1063_v10 = vmul.f32 1.442695, %v3126_v24  ;;  %v1129_v29 = vadd.f32 %v2648_v32, %v1128_v30  ;;  %v3132_v49 = vsub.f32 %v3131_v21, %v2312_v36 }
 0x160   : > { %v2660_v48 = vpop.eup %1534  ;;  %1560 = vpow2.f32 %v1057_v63  ;;  %v1065_v12 = vmul.f32 1.442695, %v3129_v2  ;;  %v1093_v62 = vadd.f32 %v2653_v51, %v1092_v54  ;;  %v3134_v63 = vsub.f32 %v2301_v43, %v2310_v61 }
 0x161   : > { %3127 = vst [vmem:[#allocation6_spill] sm:$0xff] %v2660_v48  ;;  %v2665_v44 = vpop.eup %1536  ;;  %1562 = vpow2.f32 %v1059_v13  ;;  %v1067_v6 = vmul.f32 1.442695, %v3132_v49  ;;  %v1130_v50 = vadd.f32 %v2660_v48, %v1129_v29  ;;  %v3136_v13 = vsub.f32 %v2304_v60, %v2312_v36 }
 0x162   : > { %3130 = vst [vmem:[#allocation7_spill] sm:$0xff] %v2665_v44  ;;  %v2672_v24 = vpop.eup %1538  ;;  %1564 = vpow2.f32 %v1061_v18  ;;  %v1069_v30 = vmul.f32 1.442695, %v3134_v63  ;;  %v1094_v21 = vadd.f32 %v2665_v44, %v1093_v62 }
 0x163   : > { %3133 = vst [vmem:[#allocation8_spill] sm:$0xff] %v2672_v24  ;;  %v2677_v20 = vpop.eup %1540  ;;  %1566 = vpow2.f32 %v1063_v10  ;;  %v1071_v2 = vmul.f32 1.442695, %v3136_v13  ;;  %v1131_v54 = vadd.f32 %v2672_v24, %v1130_v50 }
 0x164   : > { %3135 = vst [vmem:[#allocation9_spill] sm:$0xff] %v2677_v20  ;;  %v2684_v49 = vpop.eup %1542  ;;  %1568 = vpow2.f32 %v1065_v12  ;;  %v1095_v43 = vadd.f32 %v2677_v20, %v1094_v21 }
 0x165   : > { %3137 = vst [vmem:[#allocation10_spill] sm:$0xff] %v2684_v49  ;;  %v2686_v29 = vpop.eup %1544  ;;  %1570 = vpow2.f32 %v1067_v6  ;;  %v1132_v61 = vadd.f32 %v2684_v49, %v1131_v54 }
 0x166   : > { %3138 = vst [vmem:[#allocation11_spill] sm:$0xff] %v2686_v29  ;;  %v2690_v18 = vpop.eup %1546  ;;  %1572 = vpow2.f32 %v1069_v30  ;;  %v1096_v60 = vadd.f32 %v2686_v29, %v1095_v43 }
 0x167   : > { %3139 = vst [vmem:[#allocation12_spill] sm:$0xff] %v2690_v18  ;;  %v2692_v10 = vpop.eup %1548  ;;  %1574 = vpow2.f32 %v1071_v2  ;;  %v1133_v36 = vadd.f32 %v2690_v18, %v1132_v61 }
 0x168   : > { %3140 = vst [vmem:[#allocation13_spill] sm:$0xff] %v2692_v10  ;;  %v2696_v62 = vpop.eup %1550  ;;  %v1097_v6 = vadd.f32 %v2692_v10, %v1096_v60 }
 0x169   : > { %3141 = vst [vmem:[#allocation14_spill] sm:$0xff] %v2696_v62  ;;  %v2698_v12 = vpop.eup %1552  ;;  %v1134_v50 = vadd.f32 %v2696_v62, %v1133_v36 }
 0x16a   : > { %3142 = vst [vmem:[#allocation15_spill] sm:$0xff] %v2698_v12  ;;  %v2702_v63 = vpop.eup %1554  ;;  %v1098_v30 = vadd.f32 %v2698_v12, %v1097_v6 }
 0x16b   : > { %3143 = vst [vmem:[#allocation16_spill] sm:$0xff] %v2702_v63  ;;  %v2704_v13 = vpop.eup %1556  ;;  %v1135_v2 = vadd.f32 %v2702_v63, %v1134_v50 }
 0x16c   : > { %3144 = vst [vmem:[#allocation17_spill] sm:$0xff] %v2704_v13  ;;  %v2708_v21 = vpop.eup %1558  ;;  %v1099_v43 = vadd.f32 %v2704_v13, %v1098_v30 }
 0x16d   : > { %3145 = vst [vmem:[#allocation18_spill] sm:$0xff] %v2708_v21  ;;  %v2710_v54 = vpop.eup %1560  ;;  %v1136_v61 = vadd.f32 %v2708_v21, %v1135_v2 }
 0x16e   : > { %3146 = vst [vmem:[#allocation19_spill] sm:$0xff] %v2710_v54  ;;  %v2714_v18 = vpop.eup %1562  ;;  %v1100_v36 = vadd.f32 %v2710_v54, %v1099_v43 }
 0x16f   : > { %3147 = vst [vmem:[#allocation20_spill] sm:$0xff] %v2714_v18  ;;  %v2716_v60 = vpop.eup %1564  ;;  %v1137_v62 = vadd.f32 %v2714_v18, %v1136_v61 }
 0x170   : > { %3148 = vst [vmem:[#allocation21_spill] sm:$0xff] %v2716_v60  ;;  %v2720_v10 = vpop.eup %1566  ;;  %v1101_v50 = vadd.f32 %v2716_v60, %v1100_v36 }
 0x171   : > { %3149 = vst [vmem:[#allocation22_spill] sm:$0xff] %v2720_v10  ;;  %v2722_v6 = vpop.eup %1568  ;;  %v1138_v63 = vadd.f32 %v2720_v10, %v1137_v62 }
 0x172   : > { %v2726_v12 = vpop.eup %1570  ;;  %v1102_v2 = vadd.f32 %v2722_v6, %v1101_v50 }
 0x173   : > { %v1573_v30 = vpop.eup %1572  ;;  %v1139_v21 = vadd.f32 %v2726_v12, %v1138_v63 }
 0x174   : > { %v1575_v13 = vpop.eup %1574  ;;  %v1103_v29 = vadd.f32 %v1573_v30, %v1102_v2 }
 0x175   : > { %v1140_v43 = vadd.f32 %v1575_v13, %v1139_v21 }
 0x176   : > { %v1104_v61 = vrot.slane %v1103_v29, 4 }
 0x177   : > { %v1141_v18 = vrot.slane %v1140_v43, 4 }
 0x178   : > { %v1105_v54 = vadd.f32 %v1104_v61, %v1103_v29 }
 0x179   : > { %v1142_v49 = vadd.f32 %v1141_v18, %v1140_v43  ;;  %v3156_v43 = vld [vmem:[#allocation11_spill] sm:$0xff] }
 0x17a   : > { %v1106_v20 = vrot.slane %v1105_v54, 2 }
 0x17b   : > { %v1143_v36 = vrot.slane %v1142_v49, 2 }
 0x17c   : > { %v1107_v60 = vadd.f32 %v1106_v20, %v1105_v54  ;;  %v3152_v54 = vld [vmem:[#allocation7_spill] sm:$0xff] }
 0x17d   : > { %v1144_v62 = vadd.f32 %v1143_v36, %v1142_v49  ;;  %v3157_v36 = vld [vmem:[#allocation12_spill] sm:$0xff] }
 0x17e   : > { %v1108_v10 = vrot.slane %v1107_v60, 1 }
 0x17f   : > { %v1145_v24 = vrot.slane %v1144_v62, 1 }
 0x180   : > { %v1109_v44 = vadd.f32 %v1108_v10, %v1107_v60  ;;  %v3153_v60 = vld [vmem:[#allocation8_spill] sm:$0xff] }
 0x181   : > { %v1146_v48 = vadd.f32 %v1145_v24, %v1144_v62 }
 0x182   : > { %1576 = vrcp.f32 %v1109_v44 }
 0x183   : > { %1578 = vrcp.f32 %v1146_v48 }
 0x18f   : > { %v2733_v63 = vpop.eup %1576 }
 0x190   : > { %v2735_v21 = vpop.eup %1578  ;;  %v1213_v29 = vmul.f32 %v2733_v63, %v1573_v30  ;;  %v1151_v18 = vmul.f32 %v2733_v63, %v2414_v8  ;;  %v1153_v20 = vmul.f32 %v2733_v63, %v2421_v31  ;;  %v1155_v24 = vmul.f32 %v2733_v63, %v2441_v42  ;;  %v3155_v30 = vld [vmem:[#allocation10_spill] sm:$0xff] }
 0x191   : > { %v1214_v48 = vmul.f32 %v2735_v21, %v1575_v13  ;;  %v1152_v44 = vmul.f32 %v2735_v21, %v2416_v25  ;;  %v1154_v49 = vmul.f32 %v2735_v21, %v2426_v16  ;;  %v1156_v10 = vmul.f32 %v2735_v21, %v2450_v58 }
 0x192   : > { %1277 = vst [vmem:[%s2751_s23 + $0x1f0] sm:$0xff] %v1213_v29  ;;  %v1157_v8 = vmul.f32 %v2733_v63, %v2459_v34  ;;  %v1158_v25 = vmul.f32 %v2735_v21, %v2466_v28  ;;  %v1159_v31 = vmul.f32 %v2733_v63, %v2472_v23  ;;  %v1160_v16 = vmul.f32 %v2735_v21, %v2476_v7  ;;  %v3158_v29 = vld [vmem:[#allocation13_spill] sm:$0xff] }
 0x193   : > { %1215 = vst [vmem:[%s2751_s23] sm:$0xff] %v1151_v18  ;;  %1217 = vst [vmem:[%s2751_s23 + $0x10] sm:$0xff] %v1153_v20  ;;  %v1161_v42 = vmul.f32 %v2733_v63, %v2482_v47  ;;  %v1162_v58 = vmul.f32 %v2735_v21, %v2486_v52  ;;  %v1163_v34 = vmul.f32 %v2733_v63, %v2492_v57  ;;  %v3159_v20 = vld [vmem:[#allocation14_spill] sm:$0xff] }
 0x194   : > { %1219 = vst [vmem:[%s2751_s23 + $0x20] sm:$0xff] %v1155_v24  ;;  %1278 = vst [vmem:[%s2751_s23 + $0x1f8] sm:$0xff] %v1214_v48  ;;  %v1164_v28 = vmul.f32 %v2735_v21, %v2496_v19  ;;  %v1165_v23 = vmul.f32 %v2733_v63, %v2502_v22  ;;  %v1166_v7 = vmul.f32 %v2735_v21, %v2506_v5  ;;  %v3160_v48 = vld [vmem:[#allocation15_spill] sm:$0xff] }
 0x195   : > { %1216 = vst [vmem:[%s2751_s23 + $0x8] sm:$0xff] %v1152_v44  ;;  %1218 = vst [vmem:[%s2751_s23 + $0x18] sm:$0xff] %v1154_v49  ;;  %v1167_v47 = vmul.f32 %v2733_v63, %v2512_v41  ;;  %v1168_v52 = vmul.f32 %v2735_v21, %v2516_v9  ;;  %v1169_v57 = vmul.f32 %v2733_v63, %v2518_v33  ;;  %v3161_v49 = vld [vmem:[#allocation16_spill] sm:$0xff] }
 0x196   : > { %1220 = vst [vmem:[%s2751_s23 + $0x28] sm:$0xff] %v1156_v10  ;;  %1221 = vst [vmem:[%s2751_s23 + $0x30] sm:$0xff] %v1157_v8  ;;  %v1170_v19 = vmul.f32 %v2735_v21, %v2522_v15  ;;  %v1171_v22 = vmul.f32 %v2733_v63, %v2524_v27  ;;  %v1172_v5 = vmul.f32 %v2735_v21, %v2528_v3  ;;  %v3162_v8 = vld [vmem:[#allocation17_spill] sm:$0xff] }
 0x197   : > { %1222 = vst [vmem:[%s2751_s23 + $0x38] sm:$0xff] %v1158_v25  ;;  %1223 = vst [vmem:[%s2751_s23 + $0x40] sm:$0xff] %v1159_v31  ;;  %v1173_v41 = vmul.f32 %v2733_v63, %v2533_v37  ;;  %v1174_v9 = vmul.f32 %v2735_v21, %v2540_v0  ;;  %v1175_v33 = vmul.f32 %v2733_v63, %v2545_v40  ;;  %v3163_v31 = vld [vmem:[#allocation18_spill] sm:$0xff] }
 0x198   : > { %1224 = vst [vmem:[%s2751_s23 + $0x48] sm:$0xff] %v1160_v16  ;;  %1225 = vst [vmem:[%s2751_s23 + $0x50] sm:$0xff] %v1161_v42  ;;  %v1176_v15 = vmul.f32 %v2735_v21, %v2552_v26  ;;  %v1177_v27 = vmul.f32 %v2733_v63, %v2557_v46  ;;  %v1178_v3 = vmul.f32 %v2735_v21, %v2564_v1  ;;  %v3164_v42 = vld [vmem:[#allocation19_spill] sm:$0xff] }
 0x199   : > { %1226 = vst [vmem:[%s2751_s23 + $0x58] sm:$0xff] %v1162_v58  ;;  %1227 = vst [vmem:[%s2751_s23 + $0x60] sm:$0xff] %v1163_v34  ;;  %v1179_v37 = vmul.f32 %v2733_v63, %v2569_v11  ;;  %v1180_v0 = vmul.f32 %v2735_v21, %v2576_v59  ;;  %v1181_v40 = vmul.f32 %v2733_v63, %v2581_v53  ;;  %v3165_v34 = vld [vmem:[#allocation20_spill] sm:$0xff] }
 0x19a   : > { %1228 = vst [vmem:[%s2751_s23 + $0x68] sm:$0xff] %v1164_v28  ;;  %1229 = vst [vmem:[%s2751_s23 + $0x70] sm:$0xff] %v1165_v23  ;;  %v1182_v26 = vmul.f32 %v2735_v21, %v2588_v56  ;;  %v1183_v46 = vmul.f32 %v2733_v63, %v2593_v35  ;;  %v1184_v1 = vmul.f32 %v2735_v21, %v2600_v38  ;;  %v3150_v38 = vld [vmem:[#allocation5_spill] sm:$0xff] }
 0x19b   : > { %1230 = vst [vmem:[%s2751_s23 + $0x78] sm:$0xff] %v1166_v7  ;;  %1231 = vst [vmem:[%s2751_s23 + $0x80] sm:$0xff] %v1167_v47  ;;  %v1185_v11 = vmul.f32 %v2733_v63, %v2605_v39  ;;  %v1186_v59 = vmul.f32 %v2735_v21, %v2612_v55  ;;  %v1187_v53 = vmul.f32 %v2733_v63, %v2617_v45  ;;  %v3166_v23 = vld [vmem:[#allocation21_spill] sm:$0xff]  ;;  %v3167_v47 = vld [vmem:[#allocation22_spill] sm:$0xff] }
 0x19c   : > { %1232 = vst [vmem:[%s2751_s23 + $0x88] sm:$0xff] %v1168_v52  ;;  %1233 = vst [vmem:[%s2751_s23 + $0x90] sm:$0xff] %v1169_v57  ;;  %v1188_v56 = vmul.f32 %v2735_v21, %v2624_v4  ;;  %v1189_v35 = vmul.f32 %v2733_v63, %v2629_v14  ;;  %v1190_v39 = vmul.f32 %v2735_v21, %v3150_v38  ;;  %v3151_v14 = vld [vmem:[#allocation6_spill] sm:$0xff] }
 0x19d   : > { %1234 = vst [vmem:[%s2751_s23 + $0x98] sm:$0xff] %v1170_v19  ;;  %1235 = vst [vmem:[%s2751_s23 + $0xa0] sm:$0xff] %v1171_v22  ;;  %v1191_v55 = vmul.f32 %v2733_v63, %v2641_v17  ;;  %v1192_v45 = vmul.f32 %v2735_v21, %v2648_v32  ;;  %v1193_v4 = vmul.f32 %v2733_v63, %v2653_v51  ;;  %v3154_v51 = vld [vmem:[#allocation9_spill] sm:$0xff] }
 0x19e   : > { %1236 = vst [vmem:[%s2751_s23 + $0xa8] sm:$0xff] %v1172_v5  ;;  %1237 = vst [vmem:[%s2751_s23 + $0xb0] sm:$0xff] %v1173_v41  ;;  %v1194_v13 = vmul.f32 %v2735_v21, %v3151_v14  ;;  %v1195_v17 = vmul.f32 %v2733_v63, %v3152_v54  ;;  %v1196_v32 = vmul.f32 %v2735_v21, %v3153_v60 }
 0x19f   : > { %1238 = vst [vmem:[%s2751_s23 + $0xb8] sm:$0xff] %v1174_v9  ;;  %1239 = vst [vmem:[%s2751_s23 + $0xc0] sm:$0xff] %v1175_v33  ;;  %v1197_v50 = vmul.f32 %v2733_v63, %v3154_v51  ;;  %v1198_v2 = vmul.f32 %v2735_v21, %v3155_v30  ;;  %v1199_v61 = vmul.f32 %v2733_v63, %v3156_v43 }
 0x1a0   : > { %1240 = vst [vmem:[%s2751_s23 + $0xc8] sm:$0xff] %v1176_v15  ;;  %1241 = vst [vmem:[%s2751_s23 + $0xd0] sm:$0xff] %v1177_v27  ;;  %v1200_v62 = vmul.f32 %v2735_v21, %v3157_v36  ;;  %v1201_v18 = vmul.f32 %v2733_v63, %v3158_v29  ;;  %v1202_v24 = vmul.f32 %v2735_v21, %v3159_v20 }
 0x1a1   : > { %1242 = vst [vmem:[%s2751_s23 + $0xd8] sm:$0xff] %v1178_v3  ;;  %1243 = vst [vmem:[%s2751_s23 + $0xe0] sm:$0xff] %v1179_v37  ;;  %v1203_v44 = vmul.f32 %v2733_v63, %v3160_v48  ;;  %v1204_v10 = vmul.f32 %v2735_v21, %v3161_v49  ;;  %v1205_v25 = vmul.f32 %v2733_v63, %v3162_v8 }
 0x1a2   : > { %1244 = vst [vmem:[%s2751_s23 + $0xe8] sm:$0xff] %v1180_v0  ;;  %1245 = vst [vmem:[%s2751_s23 + $0xf0] sm:$0xff] %v1181_v40  ;;  %v1206_v16 = vmul.f32 %v2735_v21, %v3163_v31  ;;  %v1207_v58 = vmul.f32 %v2733_v63, %v3164_v42  ;;  %v1208_v28 = vmul.f32 %v2735_v21, %v3165_v34 }
 0x1a3   : > { %1246 = vst [vmem:[%s2751_s23 + $0xf8] sm:$0xff] %v1182_v26  ;;  %1247 = vst [vmem:[%s2751_s23 + $0x100] sm:$0xff] %v1183_v46  ;;  %v1209_v7 = vmul.f32 %v2733_v63, %v3166_v23  ;;  %v1210_v52 = vmul.f32 %v2735_v21, %v3167_v47  ;;  %v1211_v57 = vmul.f32 %v2733_v63, %v2722_v6 }
 0x1a4   : > { %1248 = vst [vmem:[%s2751_s23 + $0x108] sm:$0xff] %v1184_v1  ;;  %1249 = vst [vmem:[%s2751_s23 + $0x110] sm:$0xff] %v1185_v11  ;;  %v1212_v19 = vmul.f32 %v2735_v21, %v2726_v12 }
 0x1a5   : > { %1250 = vst [vmem:[%s2751_s23 + $0x118] sm:$0xff] %v1186_v59  ;;  %1251 = vst [vmem:[%s2751_s23 + $0x120] sm:$0xff] %v1187_v53 }
 0x1a6   : > { %1252 = vst [vmem:[%s2751_s23 + $0x128] sm:$0xff] %v1188_v56  ;;  %1253 = vst [vmem:[%s2751_s23 + $0x130] sm:$0xff] %v1189_v35 }
 0x1a7   : > { %1254 = vst [vmem:[%s2751_s23 + $0x138] sm:$0xff] %v1190_v39  ;;  %1255 = vst [vmem:[%s2751_s23 + $0x140] sm:$0xff] %v1191_v55 }
 0x1a8   : > { %1256 = vst [vmem:[%s2751_s23 + $0x148] sm:$0xff] %v1192_v45  ;;  %1257 = vst [vmem:[%s2751_s23 + $0x150] sm:$0xff] %v1193_v4 }
 0x1a9   : > { %1258 = vst [vmem:[%s2751_s23 + $0x158] sm:$0xff] %v1194_v13  ;;  %1259 = vst [vmem:[%s2751_s23 + $0x160] sm:$0xff] %v1195_v17 }
 0x1aa   : > { %1260 = vst [vmem:[%s2751_s23 + $0x168] sm:$0xff] %v1196_v32  ;;  %1261 = vst [vmem:[%s2751_s23 + $0x170] sm:$0xff] %v1197_v50 }
 0x1ab   : > { %1262 = vst [vmem:[%s2751_s23 + $0x178] sm:$0xff] %v1198_v2  ;;  %1263 = vst [vmem:[%s2751_s23 + $0x180] sm:$0xff] %v1199_v61 }
 0x1ac   : > { %1264 = vst [vmem:[%s2751_s23 + $0x188] sm:$0xff] %v1200_v62  ;;  %1265 = vst [vmem:[%s2751_s23 + $0x190] sm:$0xff] %v1201_v18 }
 0x1ad   : > { %1266 = vst [vmem:[%s2751_s23 + $0x198] sm:$0xff] %v1202_v24  ;;  %1267 = vst [vmem:[%s2751_s23 + $0x1a0] sm:$0xff] %v1203_v44 }
 0x1ae   : > { %1268 = vst [vmem:[%s2751_s23 + $0x1a8] sm:$0xff] %v1204_v10  ;;  %1269 = vst [vmem:[%s2751_s23 + $0x1b0] sm:$0xff] %v1205_v25 }
 0x1af   : > { %1270 = vst [vmem:[%s2751_s23 + $0x1b8] sm:$0xff] %v1206_v16  ;;  %1271 = vst [vmem:[%s2751_s23 + $0x1c0] sm:$0xff] %v1207_v58 }
 0x1b0   : > { %1272 = vst [vmem:[%s2751_s23 + $0x1c8] sm:$0xff] %v1208_v28  ;;  %1273 = vst [vmem:[%s2751_s23 + $0x1d0] sm:$0xff] %v1209_v7 }
 0x1b1   : > { %1274 = vst [vmem:[%s2751_s23 + $0x1d8] sm:$0xff] %v1210_v52  ;;  %1275 = vst [vmem:[%s2751_s23 + $0x1e0] sm:$0xff] %v1211_v57 }
 0x1b2   : > { %1276 = vst [vmem:[%s2751_s23 + $0x1e8] sm:$0xff] %v1212_v19 }
 0x1b3   : > { %1593 = shalt.err (!%p1590_p5)
}
 0x1b4   : > { %s1594_s8 = scalar_lea.hbm %s2914_s29, 8192  ;;  %s1598_s11 = scalar_lea.hbm %s2988_s3, 16384 }
 0x1b5   : > { %p1595_p6 = scmp.ne.s32.totalorder %s2914_s29, %s1594_s8  ;;  %p1599_p10 = scmp.lt.s32.totalorder %s2914_s29, %s2988_s3 }
 0x1b6   : > { %p1600_p11 = scmp.lt.s32.totalorder %s1598_s11, %s1594_s8 }
 0x1b7   : > { %p1596_p7 = pnand %p1595_p6, %p1722_p4 }
 0x1b8   : > { %p1601_p12 = por %p1600_p11, %p1599_p10 }
 0x1b9   : > { %p1597_p9 = pneg %p1596_p7 }
 0x1bb   : > { %p1602_p13 = pnand %p1601_p12, %p1597_p9 }
 0x1bd   : > { %1605 = shalt.err (!%p1602_p13)
}
 0x1be   : > { %s1660_s21 = smov 256   ;;  %s1661_s23 = smov 16  }
 0x1bf   : > { %1384 = dma.vmem_to_hbm [thread:$0]  (%p1722_p4), %s2916_s27, 8192, %s2914_s29, %s2940_s30, %s1660_s21, %s1660_s21, %s1661_s23  }
 0x1c0 PF: > { %p1390_p0 = scmp.ge.s32.totalorder %s1656_s17, 2  ;;  %s1310_s26 = sand.u32 1, %s1636_s12  }
 0x1c1   : > { %s1311_s15 = scalar_lea.sflag [#allocation3], %s1310_s26 }
 0x1c2   : > { %p1387_p1 = pnand %p1390_p0, %p1729_p8 }
 0x1c4   : > { %p1388_p2 = pneg %p1387_p1 }
 0x1c6   : > { %1631 = dma.done.wait (%p1388_p2), %s1311_s15, 8192  }
 0x1c7   : > { %1633 = vsyncadd (%p1388_p2), %s1311_s15, 4294959104  ;;  %s16_s17 = sadd.s32 1, %s1656_s17   ;;  %s3168_s12 = smov %s1640_s13 }
 0x1c8   : > { %p13_p3 = scmp.ge.s32.totalorder %s16_s17, 4   ;;  %s3169_s13 = smov %s1644_s14 }
 0x1c9   : > { %s3170_s14 = smov %s1735_s25  ;;  %s3171_s15 = smov %s1652_s16 }
 0x1ca   : > { %s3172_s16 = smov %s3174_s20  ;;  %15 = sbr.rel (!%p13_p3) target bundleno = 4 (0x4), region = 67 }
 0x1cf   :  { %1316 = vsyncpa [#allocation3], 1 }
 0x1d0   :  { %1318 = vsyncpa [#allocation3 + $0x1], 1 }

</bundles_post_ra>
